<compile_context>
chip_gen: v7x
topology: tpu7x:2x2x1
jax: 0.10.0
libtpu: 0.0.40
codegen_flags: <defaults>
</compile_context>

<pallas_src>
import numpy as np
import jax
import jax.numpy as jnp
from jax import lax
from jax.experimental import pallas as pl
from jax.experimental.pallas import tpu as pltpu

EPS = 1e-5


def basic_block_kernel(x_ref, w1_ref, w2_ref, g1_ref, b1_ref, g2_ref, b2_ref,
                       sel_ref, selT_ref, out_ref, pad_ref):
    """Fused BasicBlock: conv3x3 -> BN -> ReLU -> conv3x3 -> BN -> +x -> ReLU.

    x_ref    : (N, H, W*C)      f32  lane-dense packed NHWC input (= residual)
    w*_ref   : (3*ROWL, W*C)    bf16 block-Toeplitz conv weights (row im2col)
    g*/b*    : (1, C)           f32  BN gamma / beta
    sel_ref  : (W*C, C)         f32  lane -> channel fold matrix (tiled eye)
    selT_ref : (C, W*C)         f32  channel -> lane broadcast matrix
    out_ref  : (N, H, W*C)      f32  lane-dense output
    pad_ref  : (N, H+2, ROWL)   f32  scratch: spatially padded rows,
                                     ROWL = (W+2)*C rounded up to 128 lanes
    """
    N, H, WC = x_ref.shape
    C = sel_ref.shape[1]
    W = WC // C
    ROWL = pad_ref.shape[2]
    NH = N * H
    inv_cnt = 1.0 / float(N * H * W)
    lo, hi = C, (W + 1) * C                 # interior lane range of a padded row

    # ---- pad x into scratch: zero ONLY the 1-pixel halo, then write interior ----
    pad_ref[:, 0:1, :] = jnp.zeros((N, 1, ROWL), jnp.float32)
    pad_ref[:, H + 1:H + 2, :] = jnp.zeros((N, 1, ROWL), jnp.float32)
    pad_ref[:, 1:H + 1, 0:lo] = jnp.zeros((N, H, lo), jnp.float32)
    pad_ref[:, 1:H + 1, hi:ROWL] = jnp.zeros((N, H, ROWL - hi), jnp.float32)
    pad_ref[:, 1:H + 1, lo:hi] = x_ref[...]

    def conv3x3(w_ref):
        # Row-level im2col: output row h reads padded rows h, h+1, h+2.
        # Single MXU matmul, K = 3*ROWL, bf16 operands, f32 accumulation.
        patches = jnp.concatenate(
            [pad_ref[:, ky:ky + H, :].astype(jnp.bfloat16) for ky in range(3)],
            axis=-1)                                     # (N, H, 3*ROWL) bf16
        patches = patches.reshape(NH, 3 * ROWL)
        return jnp.dot(patches, w_ref[...],
                       preferred_element_type=jnp.float32)   # (NH, W*C) f32

    def batchnorm(y, g_ref, b_ref):
        # Training-mode BN (batch mean / biased var over N,H,W), fused affine.
        # y's lane index is w*C + c: fold over w with `sel`, broadcast back
        # with `selT` (tiny MXU ops) instead of lane-layout reshapes.
        y_sum = jnp.sum(y, axis=0, keepdims=True)            # (1, W*C)
        y_ssq = jnp.sum(y * y, axis=0, keepdims=True)        # (1, W*C)
        stats = jnp.dot(jnp.concatenate([y_sum, y_ssq], axis=0),
                        sel_ref[...],
                        preferred_element_type=jnp.float32)  # (2, C)
        mean = stats[0:1, :] * inv_cnt                       # (1, C)
        var = stats[1:2, :] * inv_cnt - mean * mean          # biased variance
        s = g_ref[...] * lax.rsqrt(var + EPS)                # (1, C)
        t = b_ref[...] - mean * s
        st_wide = jnp.dot(jnp.concatenate([s, t], axis=0),
                          selT_ref[...],
                          preferred_element_type=jnp.float32)  # (2, W*C)
        return y * st_wide[0:1, :] + st_wide[1:2, :]

    # conv1 -> bn1 -> relu
    y = jnp.maximum(batchnorm(conv3x3(w1_ref), g1_ref, b1_ref), 0.0)

    # reuse the scratch for the padded intermediate (halo is still zero)
    pad_ref[:, 1:H + 1, lo:hi] = y.reshape(N, H, WC)

    # conv2 -> bn2 -> residual add -> relu  (lane-dense output store)
    y2 = batchnorm(conv3x3(w2_ref), g2_ref, b2_ref)
    out = jnp.maximum(y2 + x_ref[...].reshape(NH, WC), 0.0)
    out_ref[...] = out.reshape(N, H, WC)


def _toeplitz_conv_weights(w_hwio, W, row_lanes):
    """Expand (3,3,Cin,Cout) HWIO weights into the (3*row_lanes, W*Cout)
    block-Toeplitz matrix used by the row-level-im2col matmul (zero wherever a
    tap falls outside the 3-wide horizontal window / into dead padding lanes)."""
    KH, KW, Cin, Cout = w_hwio.shape
    w_np = np.asarray(w_hwio, dtype=np.float32)
    M = np.zeros((KH * row_lanes, W * Cout), np.float32)
    for ky in range(KH):
        for kx in range(KW):
            for w in range(W):
                u = w + kx                           # column in the padded row
                r = ky * row_lanes + u * Cin
                M[r:r + Cin, w * Cout:(w + 1) * Cout] = w_np[ky, kx]
    return jnp.asarray(M, dtype=jnp.bfloat16)


def basic_block(x_nchw, w1, g1, b1, w2, g2, b2):
    """Wrapper: NCHW in/out, lane-dense (N, H, W*C) packing inside the kernel."""
    N, C, H, W = x_nchw.shape
    Cout = w1.shape[-1]
    assert C == Cout, "identity residual requires inplanes == planes (stride=1)"
    WC = W * C
    ROWL = (((W + 2) * C + 127) // 128) * 128        # padded-row lane width

    # NCHW -> NHWC -> (N, H, W*C): trailing dim maps onto all 128 lanes.
    x = jnp.transpose(x_nchw, (0, 2, 3, 1)).astype(jnp.float32).reshape(N, H, WC)

    w1_big = _toeplitz_conv_weights(w1, W, ROWL)
    w2_big = _toeplitz_conv_weights(w2, W, ROWL)

    sel_np = np.tile(np.eye(C, dtype=np.float32), (W, 1))     # (W*C, C)
    sel = jnp.asarray(sel_np)
    selT = jnp.asarray(np.ascontiguousarray(sel_np.T))        # (C, W*C)

    g1r = g1.reshape(1, C).astype(jnp.float32)
    b1r = b1.reshape(1, C).astype(jnp.float32)
    g2r = g2.reshape(1, C).astype(jnp.float32)
    b2r = b2.reshape(1, C).astype(jnp.float32)

    vm = pl.BlockSpec(memory_space=pltpu.MemorySpace.VMEM)
    out = pl.pallas_call(
        basic_block_kernel,
        out_shape=jax.ShapeDtypeStruct((N, H, WC), jnp.float32),
        in_specs=[vm] * 9,
        out_specs=vm,
        scratch_shapes=[pltpu.VMEM((N, H + 2, ROWL), jnp.float32)],
        compiler_params=pltpu.CompilerParams(vmem_limit_bytes=32 * 1024 * 1024),
    )(x, w1_big, w2_big, g1r, b1r, g2r, b2r, sel, selT)

    return jnp.transpose(out.reshape(N, H, W, C), (0, 3, 1, 2))   # back to NCHW


def _reference(x_nchw, w1, g1, b1, w2, g2, b2):
    """Plain-JAX f32 reference (XLA conv + training-mode BN)."""
    x = jnp.transpose(x_nchw, (0, 2, 3, 1)).astype(jnp.float32)

    def conv(x, w):
        return lax.conv_general_dilated(
            x, w, window_strides=(1, 1), padding="SAME",
            dimension_numbers=("NHWC", "HWIO", "NHWC"))

    def bn(y, g, b):
        m = jnp.mean(y, axis=(0, 1, 2), keepdims=True)
        v = jnp.mean((y - m) ** 2, axis=(0, 1, 2), keepdims=True)
        return (y - m) * lax.rsqrt(v + EPS) * g.reshape(1, 1, 1, -1) + b.reshape(1, 1, 1, -1)

    y = jnp.maximum(bn(conv(x, w1), g1, b1), 0.0)
    y2 = bn(conv(y, w2), g2, b2)
    out = jnp.maximum(y2 + x, 0.0)
    return jnp.transpose(out, (0, 3, 1, 2))


if __name__ == "__main__":
    # Small shapes consistent with BasicBlock(inplanes=planes=8, stride=1);
    # chosen so W*C = 128 (fully lane-dense packing).
    N, C, H, W = 2, 8, 16, 16
    key = jax.random.PRNGKey(0)
    kx, k1, k2, kg1, kb1, kg2, kb2 = jax.random.split(key, 7)

    x = jax.random.normal(kx, (N, C, H, W), jnp.float32)
    # conv weights in HWIO layout (3, 3, Cin, Cout); BN gamma/beta per channel.
    w1 = jax.random.normal(k1, (3, 3, C, C), jnp.float32) * 0.1
    w2 = jax.random.normal(k2, (3, 3, C, C), jnp.float32) * 0.1
    g1 = 1.0 + 0.1 * jax.random.normal(kg1, (C,), jnp.float32)
    b1 = 0.1 * jax.random.normal(kb1, (C,), jnp.float32)
    g2 = 1.0 + 0.1 * jax.random.normal(kg2, (C,), jnp.float32)
    b2 = 0.1 * jax.random.normal(kb2, (C,), jnp.float32)

    out = basic_block(x, w1, g1, b1, w2, g2, b2)
    out = jax.block_until_ready(out)

    ref = _reference(x, w1, g1, b1, w2, g2, b2)
    assert out.shape == (N, C, H, W)
    # bf16 MXU operands with f32 accumulation -> compare at ~1e-2 level.
    assert jnp.allclose(out, ref, rtol=3e-2, atol=3e-2), "mismatch vs JAX reference"

    print("KERNEL_OK")
</pallas_src>

<mosaic_0001>
module attributes {stable_mosaic.version = 11 : i64} {
  func.func @basic_block_kernel(%arg0: memref<2x16x128xf32, #tpu.memory_space<vmem>>, %arg1: memref<768x128xbf16, #tpu.memory_space<vmem>>, %arg2: memref<768x128xbf16, #tpu.memory_space<vmem>>, %arg3: memref<1x8xf32, #tpu.memory_space<vmem>>, %arg4: memref<1x8xf32, #tpu.memory_space<vmem>>, %arg5: memref<1x8xf32, #tpu.memory_space<vmem>>, %arg6: memref<1x8xf32, #tpu.memory_space<vmem>>, %arg7: memref<128x8xf32, #tpu.memory_space<vmem>>, %arg8: memref<8x128xf32, #tpu.memory_space<vmem>>, %arg9: memref<2x16x128xf32, #tpu.memory_space<vmem>>, %arg10: memref<2x18x256xf32, #tpu.memory_space<vmem>>) attributes {dimension_semantics = [], scalar_prefetch = 0 : i64, scratch_operands = 1 : i64, tpu.core_type = #tpu.core_type<tc>} {
    %cst = arith.constant 0.000000e+00 : f32
    %0 = vector.broadcast %cst : f32 to vector<2x1x256xf32>
    %c0 = arith.constant 0 : index
    %c0_0 = arith.constant 0 : index
    %c0_1 = arith.constant 0 : index
    %1 = vector.load %arg10[%c0, %c0_0, %c0_1] : memref<2x18x256xf32, #tpu.memory_space<vmem>>, vector<2x1x256xf32>
    tpu.vector_store %arg10[%c0, %c0_0, %c0_1], %0 {strides = array<i32>} : memref<2x18x256xf32, #tpu.memory_space<vmem>>, vector<2x1x256xf32>,
    %cst_2 = arith.constant 0.000000e+00 : f32
    %2 = vector.broadcast %cst_2 : f32 to vector<2x1x256xf32>
    %c0_3 = arith.constant 0 : index
    %c17 = arith.constant 17 : index
    %c0_4 = arith.constant 0 : index
    %3 = vector.load %arg10[%c0_3, %c17, %c0_4] : memref<2x18x256xf32, #tpu.memory_space<vmem>>, vector<2x1x256xf32>
    tpu.vector_store %arg10[%c0_3, %c17, %c0_4], %2 {strides = array<i32>} : memref<2x18x256xf32, #tpu.memory_space<vmem>>, vector<2x1x256xf32>,
    %cst_5 = arith.constant 0.000000e+00 : f32
    %4 = vector.broadcast %cst_5 : f32 to vector<2x16x8xf32>
    %c0_6 = arith.constant 0 : index
    %c1 = arith.constant 1 : index
    %c0_7 = arith.constant 0 : index
    %5 = vector.load %arg10[%c0_6, %c1, %c0_7] : memref<2x18x256xf32, #tpu.memory_space<vmem>>, vector<2x16x8xf32>
    tpu.vector_store %arg10[%c0_6, %c1, %c0_7], %4 {strides = array<i32>} : memref<2x18x256xf32, #tpu.memory_space<vmem>>, vector<2x16x8xf32>,
    %cst_8 = arith.constant 0.000000e+00 : f32
    %6 = vector.broadcast %cst_8 : f32 to vector<2x16x120xf32>
    %c0_9 = arith.constant 0 : index
    %c1_10 = arith.constant 1 : index
    %c136 = arith.constant 136 : index
    %7 = vector.load %arg10[%c0_9, %c1_10, %c136] : memref<2x18x256xf32, #tpu.memory_space<vmem>>, vector<2x16x120xf32>
    tpu.vector_store %arg10[%c0_9, %c1_10, %c136], %6 {strides = array<i32>} : memref<2x18x256xf32, #tpu.memory_space<vmem>>, vector<2x16x120xf32>,
    %c0_11 = arith.constant 0 : index
    %c0_12 = arith.constant 0 : index
    %c0_13 = arith.constant 0 : index
    %8 = vector.load %arg0[%c0_11, %c0_12, %c0_13] : memref<2x16x128xf32, #tpu.memory_space<vmem>>, vector<2x16x128xf32>
    %c0_14 = arith.constant 0 : index
    %c1_15 = arith.constant 1 : index
    %c8 = arith.constant 8 : index
    %9 = vector.load %arg10[%c0_14, %c1_15, %c8] : memref<2x18x256xf32, #tpu.memory_space<vmem>>, vector<2x16x128xf32>
    tpu.vector_store %arg10[%c0_14, %c1_15, %c8], %8 {strides = array<i32>} : memref<2x18x256xf32, #tpu.memory_space<vmem>>, vector<2x16x128xf32>,
    %c0_16 = arith.constant 0 : index
    %c0_17 = arith.constant 0 : index
    %c0_18 = arith.constant 0 : index
    %10 = vector.load %arg10[%c0_16, %c0_17, %c0_18] : memref<2x18x256xf32, #tpu.memory_space<vmem>>, vector<2x16x256xf32>
    %11 = arith.truncf %10 : vector<2x16x256xf32> to vector<2x16x256xbf16>
    %c0_19 = arith.constant 0 : index
    %c1_20 = arith.constant 1 : index
    %c0_21 = arith.constant 0 : index
    %12 = vector.load %arg10[%c0_19, %c1_20, %c0_21] : memref<2x18x256xf32, #tpu.memory_space<vmem>>, vector<2x16x256xf32>
    %13 = arith.truncf %12 : vector<2x16x256xf32> to vector<2x16x256xbf16>
    %c0_22 = arith.constant 0 : index
    %c2 = arith.constant 2 : index
    %c0_23 = arith.constant 0 : index
    %14 = vector.load %arg10[%c0_22, %c2, %c0_23] : memref<2x18x256xf32, #tpu.memory_space<vmem>>, vector<2x16x256xf32>
    %15 = arith.truncf %14 : vector<2x16x256xf32> to vector<2x16x256xbf16>
    %16 = tpu.concatenate %11, %13, %15 in 2 : vector<2x16x256xbf16>, vector<2x16x256xbf16>, vector<2x16x256xbf16> -> vector<2x16x768xbf16>
    %17 = vector.shape_cast %16 : vector<2x16x768xbf16> to vector<32x768xbf16>
    %c0_24 = arith.constant 0 : index
    %c0_25 = arith.constant 0 : index
    %18 = vector.load %arg1[%c0_24, %c0_25] : memref<768x128xbf16, #tpu.memory_space<vmem>>, vector<768x128xbf16>
    %cst_26 = arith.constant dense<0.000000e+00> : vector<32x128xf32>
    %19 = tpu.matmul %17, %18, %cst_26 {dimension_numbers = #tpu.dot_dimension_numbers<[1], [0], [0], [1], [0, 0, 1, 1], [], []>} : vector<32x768xbf16>, vector<768x128xbf16>, vector<32x128xf32> -> vector<32x128xf32>
    %cst_27 = arith.constant dense<0.000000e+00> : vector<128xf32>
    %20 = vector.multi_reduction <add>, %19, %cst_27 [0] : vector<32x128xf32> to vector<128xf32>
    %21 = vector.shape_cast %20 : vector<128xf32> to vector<1x128xf32>
    %22 = arith.mulf %19, %19 : vector<32x128xf32>
    %cst_28 = arith.constant dense<0.000000e+00> : vector<128xf32>
    %23 = vector.multi_reduction <add>, %22, %cst_28 [0] : vector<32x128xf32> to vector<128xf32>
    %24 = vector.shape_cast %23 : vector<128xf32> to vector<1x128xf32>
    %25 = tpu.concatenate %21, %24 in 0 : vector<1x128xf32>, vector<1x128xf32> -> vector<2x128xf32>
    %c0_29 = arith.constant 0 : index
    %c0_30 = arith.constant 0 : index
    %26 = vector.load %arg7[%c0_29, %c0_30] : memref<128x8xf32, #tpu.memory_space<vmem>>, vector<128x8xf32>
    %cst_31 = arith.constant dense<0.000000e+00> : vector<2x8xf32>
    %27 = tpu.matmul %25, %26, %cst_31 {dimension_numbers = #tpu.dot_dimension_numbers<[1], [0], [0], [1], [0, 0, 1, 1], [], []>} : vector<2x128xf32>, vector<128x8xf32>, vector<2x8xf32> -> vector<2x8xf32>
    %28 = vector.extract_strided_slice %27 {offsets = [0, 0], sizes = [1, 8], strides = [1, 1]} : vector<2x8xf32> to vector<1x8xf32>
    %cst_32 = arith.constant 0.001953125 : f32
    %29 = vector.broadcast %cst_32 : f32 to vector<1x8xf32>
    %30 = arith.mulf %28, %29 : vector<1x8xf32>
    %31 = vector.extract_strided_slice %27 {offsets = [1, 0], sizes = [1, 8], strides = [1, 1]} : vector<2x8xf32> to vector<1x8xf32>
    %cst_33 = arith.constant 0.001953125 : f32
    %32 = vector.broadcast %cst_33 : f32 to vector<1x8xf32>
    %33 = arith.mulf %31, %32 : vector<1x8xf32>
    %34 = arith.mulf %30, %30 : vector<1x8xf32>
    %35 = arith.subf %33, %34 : vector<1x8xf32>
    %c0_34 = arith.constant 0 : index
    %c0_35 = arith.constant 0 : index
    %36 = vector.load %arg3[%c0_34, %c0_35] : memref<1x8xf32, #tpu.memory_space<vmem>>, vector<1x8xf32>
    %cst_36 = arith.constant 9.99999974E-6 : f32
    %37 = vector.broadcast %cst_36 : f32 to vector<1x8xf32>
    %38 = arith.addf %35, %37 : vector<1x8xf32>
    %39 = math.rsqrt %38 : vector<1x8xf32>
    %40 = arith.mulf %36, %39 : vector<1x8xf32>
    %c0_37 = arith.constant 0 : index
    %c0_38 = arith.constant 0 : index
    %41 = vector.load %arg4[%c0_37, %c0_38] : memref<1x8xf32, #tpu.memory_space<vmem>>, vector<1x8xf32>
    %42 = arith.mulf %30, %40 : vector<1x8xf32>
    %43 = arith.subf %41, %42 : vector<1x8xf32>
    %44 = tpu.concatenate %40, %43 in 0 : vector<1x8xf32>, vector<1x8xf32> -> vector<2x8xf32>
    %c0_39 = arith.constant 0 : index
    %c0_40 = arith.constant 0 : index
    %45 = vector.load %arg8[%c0_39, %c0_40] : memref<8x128xf32, #tpu.memory_space<vmem>>, vector<8x128xf32>
    %cst_41 = arith.constant dense<0.000000e+00> : vector<2x128xf32>
    %46 = tpu.matmul %44, %45, %cst_41 {dimension_numbers = #tpu.dot_dimension_numbers<[1], [0], [0], [1], [0, 0, 1, 1], [], []>} : vector<2x8xf32>, vector<8x128xf32>, vector<2x128xf32> -> vector<2x128xf32>
    %47 = vector.extract_strided_slice %46 {offsets = [0, 0], sizes = [1, 128], strides = [1, 1]} : vector<2x128xf32> to vector<1x128xf32>
    %48 = vector.broadcast %47 : vector<1x128xf32> to vector<32x128xf32>
    %49 = arith.mulf %19, %48 : vector<32x128xf32>
    %50 = vector.extract_strided_slice %46 {offsets = [1, 0], sizes = [1, 128], strides = [1, 1]} : vector<2x128xf32> to vector<1x128xf32>
    %51 = vector.broadcast %50 : vector<1x128xf32> to vector<32x128xf32>
    %52 = arith.addf %49, %51 : vector<32x128xf32>
    %cst_42 = arith.constant 0.000000e+00 : f32
    %53 = vector.broadcast %cst_42 : f32 to vector<32x128xf32>
    %54 = arith.maximumf %52, %53 : vector<32x128xf32>
    %55 = vector.shape_cast %54 : vector<32x128xf32> to vector<2x16x128xf32>
    %c0_43 = arith.constant 0 : index
    %c1_44 = arith.constant 1 : index
    %c8_45 = arith.constant 8 : index
    %56 = vector.load %arg10[%c0_43, %c1_44, %c8_45] : memref<2x18x256xf32, #tpu.memory_space<vmem>>, vector<2x16x128xf32>
    tpu.vector_store %arg10[%c0_43, %c1_44, %c8_45], %55 {strides = array<i32>} : memref<2x18x256xf32, #tpu.memory_space<vmem>>, vector<2x16x128xf32>,
    %c0_46 = arith.constant 0 : index
    %c0_47 = arith.constant 0 : index
    %c0_48 = arith.constant 0 : index
    %57 = vector.load %arg10[%c0_46, %c0_47, %c0_48] : memref<2x18x256xf32, #tpu.memory_space<vmem>>, vector<2x16x256xf32>
    %58 = arith.truncf %57 : vector<2x16x256xf32> to vector<2x16x256xbf16>
    %c0_49 = arith.constant 0 : index
    %c1_50 = arith.constant 1 : index
    %c0_51 = arith.constant 0 : index
    %59 = vector.load %arg10[%c0_49, %c1_50, %c0_51] : memref<2x18x256xf32, #tpu.memory_space<vmem>>, vector<2x16x256xf32>
    %60 = arith.truncf %59 : vector<2x16x256xf32> to vector<2x16x256xbf16>
    %c0_52 = arith.constant 0 : index
    %c2_53 = arith.constant 2 : index
    %c0_54 = arith.constant 0 : index
    %61 = vector.load %arg10[%c0_52, %c2_53, %c0_54] : memref<2x18x256xf32, #tpu.memory_space<vmem>>, vector<2x16x256xf32>
    %62 = arith.truncf %61 : vector<2x16x256xf32> to vector<2x16x256xbf16>
    %63 = tpu.concatenate %58, %60, %62 in 2 : vector<2x16x256xbf16>, vector<2x16x256xbf16>, vector<2x16x256xbf16> -> vector<2x16x768xbf16>
    %64 = vector.shape_cast %63 : vector<2x16x768xbf16> to vector<32x768xbf16>
    %c0_55 = arith.constant 0 : index
    %c0_56 = arith.constant 0 : index
    %65 = vector.load %arg2[%c0_55, %c0_56] : memref<768x128xbf16, #tpu.memory_space<vmem>>, vector<768x128xbf16>
    %cst_57 = arith.constant dense<0.000000e+00> : vector<32x128xf32>
    %66 = tpu.matmul %64, %65, %cst_57 {dimension_numbers = #tpu.dot_dimension_numbers<[1], [0], [0], [1], [0, 0, 1, 1], [], []>} : vector<32x768xbf16>, vector<768x128xbf16>, vector<32x128xf32> -> vector<32x128xf32>
    %cst_58 = arith.constant dense<0.000000e+00> : vector<128xf32>
    %67 = vector.multi_reduction <add>, %66, %cst_58 [0] : vector<32x128xf32> to vector<128xf32>
    %68 = vector.shape_cast %67 : vector<128xf32> to vector<1x128xf32>
    %69 = arith.mulf %66, %66 : vector<32x128xf32>
    %cst_59 = arith.constant dense<0.000000e+00> : vector<128xf32>
    %70 = vector.multi_reduction <add>, %69, %cst_59 [0] : vector<32x128xf32> to vector<128xf32>
    %71 = vector.shape_cast %70 : vector<128xf32> to vector<1x128xf32>
    %72 = tpu.concatenate %68, %71 in 0 : vector<1x128xf32>, vector<1x128xf32> -> vector<2x128xf32>
    %c0_60 = arith.constant 0 : index
    %c0_61 = arith.constant 0 : index
    %73 = vector.load %arg7[%c0_60, %c0_61] : memref<128x8xf32, #tpu.memory_space<vmem>>, vector<128x8xf32>
    %cst_62 = arith.constant dense<0.000000e+00> : vector<2x8xf32>
    %74 = tpu.matmul %72, %73, %cst_62 {dimension_numbers = #tpu.dot_dimension_numbers<[1], [0], [0], [1], [0, 0, 1, 1], [], []>} : vector<2x128xf32>, vector<128x8xf32>, vector<2x8xf32> -> vector<2x8xf32>
    %75 = vector.extract_strided_slice %74 {offsets = [0, 0], sizes = [1, 8], strides = [1, 1]} : vector<2x8xf32> to vector<1x8xf32>
    %cst_63 = arith.constant 0.001953125 : f32
    %76 = vector.broadcast %cst_63 : f32 to vector<1x8xf32>
    %77 = arith.mulf %75, %76 : vector<1x8xf32>
    %78 = vector.extract_strided_slice %74 {offsets = [1, 0], sizes = [1, 8], strides = [1, 1]} : vector<2x8xf32> to vector<1x8xf32>
    %cst_64 = arith.constant 0.001953125 : f32
    %79 = vector.broadcast %cst_64 : f32 to vector<1x8xf32>
    %80 = arith.mulf %78, %79 : vector<1x8xf32>
    %81 = arith.mulf %77, %77 : vector<1x8xf32>
    %82 = arith.subf %80, %81 : vector<1x8xf32>
    %c0_65 = arith.constant 0 : index
    %c0_66 = arith.constant 0 : index
    %83 = vector.load %arg5[%c0_65, %c0_66] : memref<1x8xf32, #tpu.memory_space<vmem>>, vector<1x8xf32>
    %cst_67 = arith.constant 9.99999974E-6 : f32
    %84 = vector.broadcast %cst_67 : f32 to vector<1x8xf32>
    %85 = arith.addf %82, %84 : vector<1x8xf32>
    %86 = math.rsqrt %85 : vector<1x8xf32>
    %87 = arith.mulf %83, %86 : vector<1x8xf32>
    %c0_68 = arith.constant 0 : index
    %c0_69 = arith.constant 0 : index
    %88 = vector.load %arg6[%c0_68, %c0_69] : memref<1x8xf32, #tpu.memory_space<vmem>>, vector<1x8xf32>
    %89 = arith.mulf %77, %87 : vector<1x8xf32>
    %90 = arith.subf %88, %89 : vector<1x8xf32>
    %91 = tpu.concatenate %87, %90 in 0 : vector<1x8xf32>, vector<1x8xf32> -> vector<2x8xf32>
    %c0_70 = arith.constant 0 : index
    %c0_71 = arith.constant 0 : index
    %92 = vector.load %arg8[%c0_70, %c0_71] : memref<8x128xf32, #tpu.memory_space<vmem>>, vector<8x128xf32>
    %cst_72 = arith.constant dense<0.000000e+00> : vector<2x128xf32>
    %93 = tpu.matmul %91, %92, %cst_72 {dimension_numbers = #tpu.dot_dimension_numbers<[1], [0], [0], [1], [0, 0, 1, 1], [], []>} : vector<2x8xf32>, vector<8x128xf32>, vector<2x128xf32> -> vector<2x128xf32>
    %94 = vector.extract_strided_slice %93 {offsets = [0, 0], sizes = [1, 128], strides = [1, 1]} : vector<2x128xf32> to vector<1x128xf32>
    %95 = vector.broadcast %94 : vector<1x128xf32> to vector<32x128xf32>
    %96 = arith.mulf %66, %95 : vector<32x128xf32>
    %97 = vector.extract_strided_slice %93 {offsets = [1, 0], sizes = [1, 128], strides = [1, 1]} : vector<2x128xf32> to vector<1x128xf32>
    %98 = vector.broadcast %97 : vector<1x128xf32> to vector<32x128xf32>
    %99 = arith.addf %96, %98 : vector<32x128xf32>
    %c0_73 = arith.constant 0 : index
    %c0_74 = arith.constant 0 : index
    %c0_75 = arith.constant 0 : index
    %100 = vector.load %arg0[%c0_73, %c0_74, %c0_75] : memref<2x16x128xf32, #tpu.memory_space<vmem>>, vector<2x16x128xf32>
    %101 = vector.shape_cast %100 : vector<2x16x128xf32> to vector<32x128xf32>
    %102 = arith.addf %99, %101 : vector<32x128xf32>
    %cst_76 = arith.constant 0.000000e+00 : f32
    %103 = vector.broadcast %cst_76 : f32 to vector<32x128xf32>
    %104 = arith.maximumf %102, %103 : vector<32x128xf32>
    %105 = vector.shape_cast %104 : vector<32x128xf32> to vector<2x16x128xf32>
    %c0_77 = arith.constant 0 : index
    %c0_78 = arith.constant 0 : index
    %c0_79 = arith.constant 0 : index
    %106 = vector.load %arg9[%c0_77, %c0_78, %c0_79] : memref<2x16x128xf32, #tpu.memory_space<vmem>>, vector<2x16x128xf32>
    tpu.vector_store %arg9[%c0_77, %c0_78, %c0_79], %105 {strides = array<i32>} : memref<2x16x128xf32, #tpu.memory_space<vmem>>, vector<2x16x128xf32>,
    return
  }
}

</mosaic_0001>

<bundles_post_ra>
// kernel: tpu_custom_call.1
= control target key start
LH: loop header
LB: loop body
LE: loop exit
PB: predicated region body
PF: predicated region fallthrough
CT: control target
= control target key end

     0   :  { %14 = vsyncpa [#allocation4], 0  ;;  %s3028_s0 = inlined_call_operand.vmem [shape: f32[2,16,128], index: 0, kind: input, shape index: {}]   ;;  %s3029_s1 = inlined_call_operand.hbm [shape: bf16[768,128], index: 1, kind: input, shape index: {}]   ;;  %s3030_s2 = inlined_call_operand.hbm [shape: bf16[768,128], index: 2, kind: input, shape index: {}]   ;;  %s3031_s3 = inlined_call_operand.vmem [shape: f32[1,8], index: 3, kind: input, shape index: {}]   ;;  %s3032_s4 = inlined_call_operand.vmem [shape: f32[1,8], index: 4, kind: input, shape index: {}]   ;;  %s3033_s5 = inlined_call_operand.vmem [shape: f32[1,8], index: 5, kind: input, shape index: {}]   ;;  %s3034_s6 = inlined_call_operand.vmem [shape: f32[1,8], index: 6, kind: input, shape index: {}]   ;;  %s3035_s7 = inlined_call_operand.vmem [shape: f32[128,8], index: 7, kind: input, shape index: {}]   ;;  %s3036_s8 = inlined_call_operand.vmem [shape: f32[8,128], index: 8, kind: input, shape index: {}]   ;;  %s3037_s9 = inlined_call_operand.hbm [shape: f32[2,16,128], index: 9, kind: output, shape index: {}]  }
   0x1   :  { %15 = vsyncpa [#allocation7], 0 }
   0x2   :  { %16 = vsyncpa [#allocation5], 0  ;;  %s2609_s30 = smov [#allocation3]   ;;  %s2537_s13 = scalar_lea.hbm %s3029_s1, 6144 }
   0x3   :  { %s24_s10 = sshll.u32 %s2609_s30, 4  ;;  %p2538_p0 = scmp.ne.s32.totalorder %s3029_s1, %s2537_s13  ;;  %s25_s10 = int_to_ptr.vmem [resolvable:$true] %s24_s10 }
   0x4   :  { %p2541_p1 = scmp.lt.u32.totalorder %s2537_s13, %s3029_s1 }
   0x6   :  { %p2543_p2 = pnand %p2541_p1, %p2538_p0 }
   0x8   :  { %2546 = shalt.err (!%p2543_p2)
}
   0x9   :  { %s2547_s18 = scalar_lea.vmem %s25_s10, 6144  ;;  %p2552_p4 = scmp.lt.s32.totalorder %s25_s10, %s25_s10 }
   0xa   :  { %p2548_p3 = scmp.ne.s32.totalorder %s25_s10, %s2547_s18  ;;  %p2553_p5 = scmp.lt.s32.totalorder %s2547_s18, %s2547_s18 }
   0xc   :  { %p2554_p6 = por %p2553_p5, %p2552_p4 }
   0xe   :  { %p2555_p7 = pnand %p2554_p6, %p2548_p3 }
  0x10   :  { %2558 = shalt.err (!%p2555_p7)
}
  0x11   :  { %s2610_s19 = smov 64   ;;  %s2611_s20 = smov 4  }
  0x12   :  { %30 = dma.hbm_to_vmem [thread:$0]  %s3029_s1, 6144, %s25_s10, [#allocation4], %s2610_s19, %s2610_s19, %s2611_s20  }
  0x13   :  { %s2612_s23 = smov [#allocation6]   ;;  %s2559_s27 = scalar_lea.hbm %s3030_s2, 6144 }
  0x14   :  { %s36_s24 = sshll.u32 %s2612_s23, 4  ;;  %p2560_p8 = scmp.ne.s32.totalorder %s3030_s2, %s2559_s27  ;;  %s37_s24 = int_to_ptr.vmem [resolvable:$true] %s36_s24 }
  0x15   :  { %p2563_p9 = scmp.lt.u32.totalorder %s2559_s27, %s3030_s2 }
  0x17   :  { %p2565_p10 = pnand %p2563_p9, %p2560_p8 }
  0x19   :  { %2568 = shalt.err (!%p2565_p10)
}
  0x1a   :  { %s2569_s12 = scalar_lea.vmem %s37_s24, 6144  ;;  %p2574_p12 = scmp.lt.s32.totalorder %s37_s24, %s37_s24 }
  0x1b   :  { %p2570_p11 = scmp.ne.s32.totalorder %s37_s24, %s2569_s12  ;;  %p2575_p13 = scmp.lt.s32.totalorder %s2569_s12, %s2569_s12 }
  0x1d   :  { %p2576_p0 = por %p2575_p13, %p2574_p12 }
  0x1f   :  { %p2577_p1 = pnand %p2576_p0, %p2570_p11 }
  0x21   :  { %2580 = shalt.err (!%p2577_p1)
}
  0x22   :  { %42 = dma.hbm_to_vmem [thread:$0]  %s3030_s2, 6144, %s37_s24, [#allocation7], %s2610_s19, %s2610_s19, %s2611_s20  }
  0x23   :  { %2603 = dma.done.wait [#allocation4], 6144  }
  0x24   :  { %2604 = vsyncadd [#allocation4], 4294961152 }
  0x25   :  { %2605 = dma.done.wait [#allocation7], 6144  }
  0x26   :  { %2606 = vsyncadd [#allocation7], 4294961152  ;;  %vm77_vm0 = vcmask 64513   ;;  %v62_v0 = vlaneseq  ;;  %vm86_vm1 = vcmask 1047617   ;;  %v2613_v1 = vmov 0.0   ;;  %v95_v2 = vld [vmem:[%s3028_s0] sm:$0xff] }
  0x27   :  { %78 = vst.msk [vmem:[#allocation2] sm:$0xfe] %vm77_vm0, %v2613_v1  ;;  %83 = vst.msk [vmem:[#allocation2 + $0x30] sm:$0xfe] %vm77_vm0, %v2613_v1  ;;  %vm79_vm2 = vcmask 64512   ;;  %vm88_vm3 = vcmask 1047616  }
  0x28   :  { %vm81_vm4 = vcmask 57344   ;;  %87 = vst.msk [vmem:[#allocation2 + $0x8] sm:$0xfe] %vm86_vm1, %v2613_v1  ;;  %92 = vst.msk [vmem:[#allocation2 + $0x38] sm:$0xfe] %vm86_vm1, %v2613_v1  ;;  %vm90_vm5 = vcmask 1040448  }
  0x29   :  { %80 = vst.msk [vmem:[#allocation2 + $0x10] sm:$0xff] %vm79_vm2, %v2613_v1  ;;  %84 = vst.msk [vmem:[#allocation2 + $0x40] sm:$0xff] %vm79_vm2, %v2613_v1  ;;  %vm64_vm6 = vcmp.lt.s32.totalorder %v62_v0, 256  ;;  %v96_v3 = vld [vmem:[%s3028_s0 + $0x8] sm:$0xff]  ;;  %vm103_vm7 = vcmask 1040384   ;;  %v97_v4 = vld [vmem:[%s3028_s0 + $0x10] sm:$0xff] }
  0x2a   :  { %89 = vst.msk [vmem:[#allocation2 + $0x18] sm:$0xff] %vm88_vm3, %v2613_v1  ;;  %93 = vst.msk [vmem:[#allocation2 + $0x48] sm:$0xff] %vm88_vm3, %v2613_v1  ;;  %v104_v5 = vrot.slane %v95_v2, 7  ;;  %v105_v6 = vrot.slane %v96_v3, 7  ;;  %v107_v7 = vrot.slane %v97_v4, 7  ;;  %v98_v8 = vld [vmem:[%s3028_s0 + $0x18] sm:$0xff] }
  0x2b   :  { %82 = vst.msk [vmem:[#allocation2 + $0x20] sm:$0x1] %vm81_vm4, %v2613_v1  ;;  %85 = vst.msk [vmem:[#allocation2 + $0x50] sm:$0x1] %vm81_vm4, %v2613_v1  ;;  %v108_v9 = vrot.slane %v98_v8, 7  ;;  %v2437_v10 = vld [vmem:[#allocation3 + $0x40] sm:$0xff]  }
  0x2c   :  { %91 = vst.msk [vmem:[#allocation2 + $0x28] sm:$0x1] %vm90_vm5, %v2613_v1  ;;  %94 = vst.msk [vmem:[#allocation2 + $0x58] sm:$0x1] %vm90_vm5, %v2613_v1  ;;  %s2614_s20 = smov 8   ;;  %v2438_v11 = vld [vmem:[#allocation3] sm:$0xff]   ;;  %v106_v12 = vsel %vm103_vm7, %v104_v5, %v105_v6  ;;  %2092 = vmatprep.subr.bf16.mxu0 %v2437_v10 }
  0x2d   :  { %66 = vst.msk [vmem:[#allocation2] ss:$8 sm:$0x3] %vm64_vm6, %v2613_v1  ;;  %69 = vst.msk [vmem:[#allocation2 + $0x30] ss:$8 sm:$0x3] %vm64_vm6, %v2613_v1  ;;  %110 = vrot.lane.b32.xlu0 %v104_v5, %s2614_s20  ;;  %116 = vrot.lane.b32.xlu1 %v107_v7, %s2614_s20  ;;  %v109_v13 = vsel %vm103_vm7, %v107_v7, %v108_v9 }
  0x2e   :  { %72 = vst.msk [vmem:[#allocation2 + $0x21] ss:$8 sm:$0x3] %vm64_vm6, %v2613_v1  ;;  %75 = vst.msk [vmem:[#allocation2 + $0x51] ss:$8 sm:$0x3] %vm64_vm6, %v2613_v1  ;;  %2093 = vmatpush3.bf16.msra.mxu0 %v2438_v11 }
  0x2f   :  { %v2439_v14 = vld [vmem:[#allocation3 + $0x48] sm:$0xff]   ;;  %v2441_v16 = vld [vmem:[#allocation3 + $0x50] sm:$0xff]   ;;  %v2443_v18 = vld [vmem:[#allocation3 + $0xc0] sm:$0xff]   ;;  %vm184_vm8 = vsmask.f32 7424  ;;  %vm245_vm9 = vcmask 1046528  }
  0x30   :  { %v2440_v15 = vld [vmem:[#allocation3 + $0x8] sm:$0xff]   ;;  %2094 = vmatprep.subr.bf16.mxu0 %v2439_v14  ;;  %v2442_v17 = vld [vmem:[#allocation3 + $0x10] sm:$0xff]   ;;  %v2444_v19 = vld [vmem:[#allocation3 + $0x80] sm:$0xff]   ;;  %2120 = vmatprep.subr.bf16.mxu1 %v2443_v18  ;;  %vm2616_vm10 = vmmov 0   ;;  %s2618_s21 = smov [#allocation8]  }
  0x31   :  { %112 = vrot.lane.b32.xlu0 %v106_v12, %s2614_s20  ;;  %118 = vrot.lane.b32.xlu1 %v109_v13, %s2614_s20  ;;  %v2445_v20 = vld [vmem:[#allocation3 + $0x58] sm:$0xff]   ;;  %v2447_v22 = vld [vmem:[#allocation3 + $0xc8] sm:$0xff]   ;;  %v2449_v24 = vld [vmem:[#allocation3 + $0x60] sm:$0xff]   ;;  %s1981_s22 = sshll.u32 %s2618_s21, 4  ;;  %s1982_s22 = int_to_ptr.vmem [resolvable:$true] %s1981_s22 }
  0x32   :  { %2095 = vmatpush3.bf16.msra.mxu0 %v2440_v15  ;;  %v2446_v21 = vld [vmem:[#allocation3 + $0x18] sm:$0xff]   ;;  %2121 = vmatpush3.bf16.msra.mxu1 %v2444_v19  ;;  %v2448_v23 = vld [vmem:[#allocation3 + $0x88] sm:$0xff]   ;;  %v2450_v25 = vld [vmem:[#allocation3 + $0x20] sm:$0xff]   ;;  %p2586_p3 = scmp.lt.s32.totalorder %s1982_s22, %s1982_s22 }
  0x33   :  { %2096 = vmatprep.subr.bf16.mxu0 %v2441_v16  ;;  %2122 = vmatprep.subr.bf16.mxu1 %v2447_v22  ;;  %v2451_v26 = vld [vmem:[#allocation3 + $0xd0] sm:$0xff]   ;;  %v2453_v28 = vld [vmem:[#allocation3 + $0x68] sm:$0xff]   ;;  %v2455_v30 = vld [vmem:[#allocation3 + $0xd8] sm:$0xff]  }
  0x34   :  { %v2452_v27 = vld [vmem:[#allocation3 + $0x90] sm:$0xff]   ;;  %v2454_v29 = vld [vmem:[#allocation3 + $0x28] sm:$0xff]   ;;  %v2456_v31 = vld [vmem:[#allocation3 + $0x98] sm:$0xff]  }
  0x35   :  { %114 = vrot.lane.b32.xlu0 %v105_v6, %s2614_s20  ;;  %120 = vrot.lane.b32.xlu1 %v108_v9, %s2614_s20  ;;  %v2457_v32 = vld [vmem:[#allocation3 + $0x70] sm:$0xff]   ;;  %v2459_v34 = vld [vmem:[#allocation3 + $0xe0] sm:$0xff]   ;;  %v2461_v36 = vld [vmem:[#allocation3 + $0x78] sm:$0xff]  }
  0x36   :  { %2097 = vmatpush3.bf16.msra.mxu0 %v2442_v17  ;;  %2123 = vmatpush3.bf16.msra.mxu1 %v2448_v23  ;;  %v2458_v33 = vld [vmem:[#allocation3 + $0x30] sm:$0xff]   ;;  %v2460_v35 = vld [vmem:[#allocation3 + $0xa0] sm:$0xff]   ;;  %v2462_v37 = vld [vmem:[#allocation3 + $0x38] sm:$0xff]  }
  0x37   :  { %2098 = vmatprep.subr.bf16.mxu0 %v2445_v20  ;;  %2124 = vmatprep.subr.bf16.mxu1 %v2451_v26  ;;  %v2463_v38 = vld [vmem:[#allocation3 + $0xe8] sm:$0xff]   ;;  %v2465_v40 = vld [vmem:[#allocation3 + $0x140] sm:$0xff]   ;;  %v2467_v41 = vld [vmem:[#allocation3 + $0xf0] sm:$0xff]  }
  0x38   :  { %v2464_v39 = vld [vmem:[#allocation3 + $0xa8] sm:$0xff]   ;;  %v2468_v42 = vld [vmem:[#allocation3 + $0xb0] sm:$0xff]   ;;  %v2471_v43 = vld [vmem:[#allocation3 + $0xf8] sm:$0xff]  }
  0x39   :  { %v2472_v44 = vld [vmem:[#allocation3 + $0xb8] sm:$0xff]   ;;  %v2466_v55 = vld [vmem:[#allocation3 + $0x100] sm:$0xff]   ;;  %v2469_v5 = vld [vmem:[#allocation3 + $0x148] sm:$0xff]  }
  0x3a   :  { %2099 = vmatpush3.bf16.msra.mxu0 %v2446_v21  ;;  %2125 = vmatpush3.bf16.msra.mxu1 %v2452_v27  ;;  %v2470_v17 = vld [vmem:[#allocation3 + $0x108] sm:$0xff]  }
  0x3b   :  { %2100 = vmatprep.subr.bf16.mxu0 %v2449_v24  ;;  %2126 = vmatprep.subr.bf16.mxu1 %v2455_v30  ;;  %v2473_v24 = vld [vmem:[#allocation3 + $0x150] sm:$0xff]  }
  0x3e   :  { %2101 = vmatpush3.bf16.msra.mxu0 %v2450_v25  ;;  %2127 = vmatpush3.bf16.msra.mxu1 %v2456_v31 }
  0x3f   :  { %2102 = vmatprep.subr.bf16.mxu0 %v2453_v28  ;;  %2128 = vmatprep.subr.bf16.mxu1 %v2459_v34 }
  0x42   :  { %2103 = vmatpush3.bf16.msra.mxu0 %v2454_v29  ;;  %2129 = vmatpush3.bf16.msra.mxu1 %v2460_v35 }
  0x43   :  { %2104 = vmatprep.subr.bf16.mxu0 %v2457_v32  ;;  %2130 = vmatprep.subr.bf16.mxu1 %v2463_v38 }
  0x46   :  { %2105 = vmatpush3.bf16.msra.mxu0 %v2458_v33  ;;  %2131 = vmatpush3.bf16.msra.mxu1 %v2464_v39  ;;  %v2474_v39 = vld [vmem:[#allocation3 + $0x110] sm:$0xff]  }
  0x47   :  { %2106 = vmatprep.subr.bf16.mxu0 %v2461_v36  ;;  %2132 = vmatprep.subr.bf16.mxu1 %v2467_v41 }
  0x4a   :  { %2107 = vmatpush3.bf16.msra.mxu0 %v2462_v37  ;;  %2133 = vmatpush3.bf16.msra.mxu1 %v2468_v42 }
  0x4b   :  { %2148 = vmatprep.subr.bf16.mxu0 %v2465_v40  ;;  %2134 = vmatprep.subr.bf16.mxu1 %v2471_v43  ;;  %v2475_v43 = vld [vmem:[#allocation3 + $0x158] sm:$0xff]  }
  0x4e   :  { %2135 = vmatpush3.bf16.msra.mxu1 %v2472_v44 }
  0x9f   :  { %v111_v45 = vpop.permute.xlu0 %110  ;;  %v117_v46 = vpop.permute.xlu1 %116 }
  0xa0   :  { %128 = vst.msk [vmem:[#allocation2] sm:$0xfe] %vm86_vm1, %v111_v45  ;;  %134 = vst.msk [vmem:[#allocation2 + $0x30] sm:$0xfe] %vm86_vm1, %v117_v46 }
  0xa1   :  { %129 = vst.msk [vmem:[#allocation2 + $0x8] sm:$0xfe] %vm77_vm0, %v111_v45  ;;  %135 = vst.msk [vmem:[#allocation2 + $0x38] sm:$0xfe] %vm77_vm0, %v117_v46 }
  0xa3   :  { %v113_v47 = vpop.permute.xlu0 %112  ;;  %v119_v48 = vpop.permute.xlu1 %118 }
  0xa4   :  { %130 = vst.msk [vmem:[#allocation2 + $0x10] sm:$0xff] %vm88_vm3, %v113_v47  ;;  %136 = vst.msk [vmem:[#allocation2 + $0x40] sm:$0xff] %vm88_vm3, %v119_v48 }
  0xa5   :  { %131 = vst.msk [vmem:[#allocation2 + $0x18] sm:$0xff] %vm79_vm2, %v113_v47  ;;  %137 = vst.msk [vmem:[#allocation2 + $0x48] sm:$0xff] %vm79_vm2, %v119_v48 }
  0xa7   :  { %v115_v49 = vpop.permute.xlu0 %114  ;;  %v121_v50 = vpop.permute.xlu1 %120  ;;  %v140_v54 = vld [vmem:[#allocation2] sm:$0xff]  ;;  %v144_v2 = vld [vmem:[#allocation2 + $0x30] sm:$0xff] }
  0xa8   :  { %132 = vst.msk [vmem:[#allocation2 + $0x20] sm:$0x1] %vm90_vm5, %v115_v49  ;;  %138 = vst.msk [vmem:[#allocation2 + $0x50] sm:$0x1] %vm90_vm5, %v121_v50  ;;  %v141_v51 = vld [vmem:[#allocation2 + $0x8] sm:$0xff]  ;;  %v145_v52 = vld [vmem:[#allocation2 + $0x38] sm:$0xff] }
  0xa9   :  { %133 = vst.msk [vmem:[#allocation2 + $0x28] sm:$0x1] %vm81_vm4, %v115_v49  ;;  %139 = vst.msk [vmem:[#allocation2 + $0x58] sm:$0x1] %vm81_vm4, %v121_v50  ;;  %v153_v53 = vld [vmem:[#allocation2 + $0x8] sm:$0xfe] }
  0xaa   :  { %v157_v56 = vld [vmem:[#allocation2 + $0x38] sm:$0xfe]  ;;  %v152_v4 = vld [vmem:[#allocation2] sm:$0xfe]  ;;  %v156_v7 = vld [vmem:[#allocation2 + $0x30] sm:$0xfe] }
  0xab   :  { %v2757_v58 = vld [vmem:[#allocation2 + $0x10] sm:$0xff]  ;;  %v2765_v3 = vld [vmem:[#allocation2 + $0x40] sm:$0xff]  ;;  %v169_v9 = vld [vmem:[#allocation2 + $0x8] sm:$0xfc] }
  0xac   :  { %v2755_v57 = vld [vmem:[#allocation2 + $0x18] sm:$0xff]  ;;  %v2759_v59 = vld [vmem:[#allocation2 + $0x48] sm:$0xff]  ;;  %v148_v62 = vpack.c.bf16 %v2757_v58, %v140_v54  ;;  %v160_v6 = vpack.c.bf16 %v2757_v58, %v152_v4  ;;  %v150_v11 = vpack.c.bf16 %v2765_v3, %v144_v2  ;;  %v164_v23 = vpack.c.bf16 %v2765_v3, %v156_v7  ;;  %v2481_v4 = vld [vmem:[#allocation3 + $0x170] sm:$0xff]  }
  0xad   :  { %v149_v60 = vpack.c.bf16 %v2755_v57, %v141_v51  ;;  %v161_v61 = vpack.c.bf16 %v2755_v57, %v153_v53  ;;  %v151_v63 = vpack.c.bf16 %v2759_v59, %v145_v52  ;;  %v165_v10 = vpack.c.bf16 %v2759_v59, %v157_v56  ;;  %v2476_v54 = vld [vmem:[#allocation3 + $0x118] sm:$0xff]   ;;  %v2477_v56 = vld [vmem:[#allocation3 + $0x160] sm:$0xff]   ;;  %v2480_v2 = vld [vmem:[#allocation3 + $0x128] sm:$0xff]  }
  0xae   :  { %v188_v15 = vshll.u32 %v160_v6, 16  ;;  %v177_v16 = vpack.c.bf16 %v2755_v57, %v169_v9  ;;  %v186_v25 = vshrl.u32 %v160_v6, 16  ;;  %v210_v45 = vshrl.u32 %v164_v23, 16  ;;  %v2482_v6 = vld [vmem:[#allocation3 + $0x130] sm:$0xff]   ;;  %v173_v7 = vld [vmem:[#allocation2 + $0x38] sm:$0xfc] }
  0xaf   :  { %678 = vmatprep.mubr.bf16.mxu0 %v149_v60  ;;  %v200_v8 = vshll.u32 %v161_v61, 16  ;;  %v198_v13 = vshrl.u32 %v161_v61, 16  ;;  %v154_v14 = vld [vmem:[#allocation2 + $0x20] sm:$0x1]  ;;  %v158_v29 = vld [vmem:[#allocation2 + $0x50] sm:$0x1] }
  0xb0   :  { %679 = vmatmul.mubr.bf16.vlgmr.msra.gmra.mrb[0].mxu0 %v148_v62  ;;  %v155_v12 = vld [vmem:[#allocation2 + $0x28] sm:$0x1]  ;;  %v162_v20 = vpack.c.bf16 %v154_v14, %v154_v14  ;;  %v159_v22 = vld [vmem:[#allocation2 + $0x58] sm:$0x1]  ;;  %v190_v26 = vrot.slane %v188_v15, 1  ;;  %v222_v32 = vshrl.u32 %v165_v10, 16  ;;  %v166_v37 = vpack.c.bf16 %v158_v29, %v158_v29 }
  0xb1   :  { %2149 = vmatpush3.bf16.msra.mxu0 %v2466_v55  ;;  %686 = vmatprep.mubr.bf16.mxu0 %v151_v63  ;;  %v163_v18 = vpack.c.bf16 %v155_v12, %v155_v12  ;;  %v202_v19 = vrot.slane %v200_v8, 1  ;;  %v171_v21 = vld [vmem:[#allocation2 + $0x28] sm:$0x3]  ;;  %v167_v28 = vpack.c.bf16 %v159_v22, %v159_v22  ;;  %v224_v33 = vshll.u32 %v165_v10, 16  ;;  %v2478_v61 = vld [vmem:[#allocation3 + $0x120] sm:$0xff]   ;;  %v2483_v9 = vld [vmem:[#allocation3 + $0x178] sm:$0xff]  }
  0xb2   :  { %2150 = vmatprep.subr.bf16.mxu0 %v2469_v5  ;;  %v179_v27 = vpack.c.bf16 %v171_v21, %v171_v21  ;;  %v193_v31 = vshll.u32 %v162_v20, 16  ;;  %v191_v35 = vor.u32 %v190_v26, %v186_v25  ;;  %v212_v46 = vshll.u32 %v164_v23, 16  ;;  %v2479_v63 = vld [vmem:[#allocation3 + $0x168] sm:$0xff]   ;;  %v170_v5 = vld [vmem:[#allocation2 + $0x20] sm:$0x3]  ;;  %v2484_v14 = vld [vmem:[#allocation3 + $0x138] sm:$0xff]  }
  0xb3   :  { %v205_v30 = vshll.u32 %v163_v18, 16  ;;  %v203_v34 = vor.u32 %v202_v19, %v198_v13  ;;  %v229_v36 = vshll.u32 %v167_v28, 16  ;;  %v226_v42 = vrot.slane %v224_v33, 1  ;;  %v175_v8 = vld [vmem:[#allocation2 + $0x58] sm:$0x3]  ;;  %v817_v28 = vld [vmem:[%s3035_s7 + $0x8] sm:$0xff] }
  0xb4   :  { %v195_v40 = vrot.slane %v193_v31, 1  ;;  %v250_v41 = vrot.slane %v179_v27, 1  ;;  %v217_v47 = vshll.u32 %v166_v37, 16  ;;  %v249_v50 = vrot.slane %v177_v16, 1  ;;  %v172_v19 = vld [vmem:[#allocation2 + $0x30] sm:$0xfc] }
  0xb5   :  { %2151 = vmatpush3.bf16.msra.mxu0 %v2470_v17  ;;  %v207_v38 = vrot.slane %v205_v30, 1  ;;  %v231_v44 = vrot.slane %v229_v36, 1  ;;  %v227_v51 = vor.u32 %v226_v42, %v222_v32  ;;  %v214_v52 = vrot.slane %v212_v46, 1  ;;  %v174_v20 = vld [vmem:[#allocation2 + $0x50] sm:$0x3]  ;;  %v816_v27 = vld [vmem:[%s3035_s7] sm:$0xff] }
  0xb6   :  { %2152 = vmatprep.subr.bf16.mxu0 %v2473_v24  ;;  %v196_v49 = vsel %vm184_vm8, %v191_v35, %v195_v40  ;;  %v251_v53 = vsel %vm245_vm9, %v249_v50, %v250_v41  ;;  %v219_v60 = vrot.slane %v217_v47, 1  ;;  %v178_v10 = vpack.c.bf16 %v170_v5, %v170_v5  ;;  %v818_v30 = vld [vmem:[%s3035_s7 + $0x10] sm:$0xff]  ;;  %v819_v31 = vld [vmem:[%s3035_s7 + $0x18] sm:$0xff]  ;;  %v820_v33 = vld [vmem:[%s3035_s7 + $0x20] sm:$0xff] }
  0xb7   :  { %v208_v48 = vsel %vm184_vm8, %v203_v34, %v207_v38  ;;  %v232_v55 = vsel %vm184_vm8, %v227_v51, %v231_v44  ;;  %v215_v57 = vor.u32 %v214_v52, %v210_v45  ;;  %v181_v12 = vpack.c.bf16 %v2759_v59, %v173_v7  ;;  %v821_v34 = vld [vmem:[%s3035_s7 + $0x28] sm:$0xff]  ;;  %v822_v36 = vld [vmem:[%s3035_s7 + $0x30] sm:$0xff]  ;;  %v823_v37 = vld [vmem:[%s3035_s7 + $0x38] sm:$0xff] }
  0xb8   :  { %687 = vmatmul.mubr.bf16.gmra.mrb[4].mxu0 %v150_v11  ;;  %727 = vmatprep.mubr.bf16.mxu1 %v208_v48  ;;  %v168_v11 = vld [vmem:[#allocation2] sm:$0xfc]  ;;  %v183_v13 = vpack.c.bf16 %v175_v8, %v175_v8  ;;  %v247_v16 = vrot.slane %v178_v10, 1  ;;  %v180_v23 = vpack.c.bf16 %v2765_v3, %v172_v19  ;;  %v182_v24 = vpack.c.bf16 %v174_v20, %v174_v20  ;;  %v825_v40 = vld [vmem:[%s3035_s7 + $0x48] sm:$0xff]  ;;  %v826_v42 = vld [vmem:[%s3035_s7 + $0x50] sm:$0xff] }
  0xb9   :  { %2153 = vmatpush3.bf16.msra.mxu0 %v2474_v39  ;;  %728 = vmatmul.mubr.bf16.vlgmr.msra.gmra.mrb[0].mxu1 %v196_v49  ;;  %v220_v62 = vsel %vm184_vm8, %v215_v57, %v219_v60  ;;  %v176_v15 = vpack.c.bf16 %v2757_v58, %v168_v11  ;;  %v255_v17 = vrot.slane %v181_v12, 1  ;;  %v2615_v29 = vmov 0.0|0.0   ;;  %v824_v39 = vld [vmem:[%s3035_s7 + $0x40] sm:$0xff]  ;;  %v829_v46 = vld [vmem:[%s3035_s7 + $0x68] sm:$0xff]  ;;  %v830_v48 = vld [vmem:[%s3035_s7 + $0x70] sm:$0xff] }
  0xba   :  { %776 = vmatprep.mubr.bf16.mxu0 %v251_v53  ;;  %2154 = vmatprep.subr.bf16.mxu0 %v2475_v43  ;;  %v256_v18 = vrot.slane %v183_v13, 1  ;;  %v252_v25 = vrot.slane %v180_v23, 1  ;;  %v253_v26 = vrot.slane %v182_v24, 1  ;;  %v2790_v3 = vpack.c.bf16 %v817_v28, %v816_v27  ;;  %v827_v43 = vld [vmem:[%s3035_s7 + $0x58] sm:$0xff]  ;;  %v828_v45 = vld [vmem:[%s3035_s7 + $0x60] sm:$0xff] }
  0xbb   :  { %735 = vmatprep.mubr.bf16.mxu1 %v232_v55  ;;  %v246_v21 = vrot.slane %v176_v15, 1  ;;  %2378 = vmatprep.subr.bf16.mxu1 %v2615_v29  ;;  %v2800_v32 = vpack.c.bf16 %v819_v31, %v818_v30  ;;  %v2810_v35 = vpack.c.bf16 %v821_v34, %v820_v33  ;;  %v2820_v38 = vpack.c.bf16 %v823_v37, %v822_v36  ;;  %v831_v49 = vld [vmem:[%s3035_s7 + $0x78] sm:$0xff] }
  0xbc   :  { %v257_v59 = vsel %vm245_vm9, %v255_v17, %v256_v18  ;;  %v254_v58 = vsel %vm245_vm9, %v252_v25, %v253_v26  ;;  %2380 = vmatpush3.bf16.msra.mxu1 %v2790_v3  ;;  %v2830_v41 = vpack.c.bf16 %v825_v40, %v824_v39  ;;  %v2841_v44 = vpack.c.bf16 %v827_v43, %v826_v42 }
  0xbd   :  { %2155 = vmatpush3.bf16.msra.mxu0 %v2476_v54  ;;  %v248_v22 = vsel %vm245_vm9, %v246_v21, %v247_v16  ;;  %2381 = vmatprep.subr.bf16.mxu1 %v2615_v29  ;;  %v2851_v47 = vpack.c.bf16 %v829_v46, %v828_v45  ;;  %v2861_v50 = vpack.c.bf16 %v831_v49, %v830_v48 }
  0xbe   :  { %2156 = vmatprep.subr.bf16.mxu0 %v2477_v56 }
  0xc0   :  { %2383 = vmatpush3.bf16.msra.mxu1 %v2800_v32 }
  0xc1   :  { %2157 = vmatpush3.bf16.msra.mxu0 %v2478_v61  ;;  %736 = vmatmul.mubr.bf16.gmra.mrb[4].mxu1 %v220_v62 }
  0xc2   :  { %2158 = vmatprep.subr.bf16.mxu0 %v2479_v63  ;;  %2384 = vmatprep.subr.bf16.mxu1 %v2615_v29 }
  0xc3   :  { %2330 = vmatprep.mubr.msk.f32.mxu1 %vm2616_vm10, %v2613_v1 }
  0xc4   :  { %2386 = vmatpush3.bf16.msra.mxu1 %v2810_v35 }
  0xc5   :  { %2159 = vmatpush3.bf16.msra.mxu0 %v2480_v2  ;;  %2387 = vmatprep.subr.bf16.mxu1 %v2615_v29 }
  0xc6   :  { %2160 = vmatprep.subr.bf16.mxu0 %v2481_v4 }
  0xc8   :  { %2389 = vmatpush3.bf16.msra.mxu1 %v2820_v38 }
  0xc9   :  { %2161 = vmatpush3.bf16.msra.mxu0 %v2482_v6  ;;  %2390 = vmatprep.subr.bf16.mxu1 %v2615_v29 }
  0xca   :  { %2162 = vmatprep.subr.bf16.mxu0 %v2483_v9 }
  0xcc   :  { %2392 = vmatpush3.bf16.msra.mxu1 %v2830_v41 }
  0xcd   :  { %2163 = vmatpush3.bf16.msra.mxu0 %v2484_v14  ;;  %2393 = vmatprep.subr.bf16.mxu1 %v2615_v29 }
  0xd0   :  { %777 = vmatmul.mubr.bf16.vlgmr.msra.gmra.mrb[8].mxu0 %v248_v22  ;;  %2395 = vmatpush3.bf16.msra.mxu1 %v2841_v44 }
  0xd1   :  { %784 = vmatprep.mubr.bf16.mxu0 %v257_v59  ;;  %2396 = vmatprep.subr.bf16.mxu1 %v2615_v29 }
  0xd4   :  { %2398 = vmatpush3.bf16.msra.mxu1 %v2851_v47 }
  0xd5   :  { %2399 = vmatprep.subr.bf16.mxu1 %v2615_v29 }
  0xd8   :  { %785 = vmatmul.mubr.bf16.gmra.mrb[12].mxu0 %v254_v58  ;;  %2401 = vmatpush3.bf16.msra.mxu1 %v2861_v50 }
  0xd9   :  { %2333 = vmatprep.subr.mxu1 %v2613_v1 }
 0x183   :  { %v2108_v51 = vpop.f32.mrb[0].mxu0 }
 0x184   :  { %v2109_v52 = vpop.f32.mrb[1].mxu0 }
 0x185   :  { %v2110_v53 = vadd.f32 %v2109_v52, %v2108_v51  ;;  %v2111_v54 = vpop.f32.mrb[2].mxu0 }
 0x186   :  { %v2112_v55 = vpop.f32.mrb[3].mxu0 }
 0x187   :  { %v2113_v56 = vadd.f32 %v2112_v55, %v2111_v54 }
 0x18b   :  { %v2114_v57 = vpop.f32.mrb[4].mxu0 }
 0x18c   :  { %v2136_v60 = vpop.f32.mrb[0].mxu1  ;;  %v2115_v61 = vpop.f32.mrb[5].mxu0 }
 0x18d   :  { %v2137_v62 = vpop.f32.mrb[1].mxu1  ;;  %v2116_v63 = vadd.f32 %v2115_v61, %v2114_v57  ;;  %v2117_v2 = vpop.f32.mrb[6].mxu0 }
 0x18e   :  { %v2138_v4 = vadd.f32 %v2137_v62, %v2136_v60  ;;  %v2139_v5 = vpop.f32.mrb[2].mxu1  ;;  %v2118_v6 = vpop.f32.mrb[7].mxu0 }
 0x18f   :  { %v2140_v7 = vpop.f32.mrb[3].mxu1  ;;  %v2119_v8 = vadd.f32 %v2118_v6, %v2117_v2  ;;  %v2892_v6 = vld [vmem:[%s3036_s8] sm:$0xff] }
 0x190   :  { %v730_v9 = vadd.f32 %v2138_v4, %v2110_v53  ;;  %v2141_v10 = vadd.f32 %v2140_v7, %v2139_v5 }
 0x192   :  { %v733_v11 = vadd.f32 %v2141_v10, %v2113_v56 }
 0x194   :  { %v2142_v12 = vpop.f32.mrb[4].mxu1 }
 0x195   :  { %v2143_v13 = vpop.f32.mrb[5].mxu1 }
 0x196   :  { %v2144_v14 = vadd.f32 %v2143_v13, %v2142_v12  ;;  %v2145_v15 = vpop.f32.mrb[6].mxu1 }
 0x197   :  { %v2146_v16 = vpop.f32.mrb[7].mxu1 }
 0x198   :  { %v738_v17 = vadd.f32 %v2144_v14, %v2116_v63  ;;  %v2147_v18 = vadd.f32 %v2146_v16, %v2145_v15  ;;  %v2617_v14 = vmov 1966171168  }
 0x199   :  { %v913_v15 = vunpack.c.l.s4 %v2617_v14 }
 0x19a   :  { %v741_v19 = vadd.f32 %v2147_v18, %v2119_v8 }
 0x19b   :  { %v914_v16 = vunpack.c.0.s8 %v913_v15 }
 0x1a3   :  { %v2164_v20 = vpop.f32.mrb[8].mxu0 }
 0x1a4   :  { %v2165_v21 = vpop.f32.mrb[9].mxu0 }
 0x1a5   :  { %v2166_v22 = vadd.f32 %v2165_v21, %v2164_v20  ;;  %v2167_v23 = vpop.f32.mrb[10].mxu0 }
 0x1a6   :  { %v2168_v24 = vpop.f32.mrb[11].mxu0 }
 0x1a7   :  { %v2866_v59 = vadd.f32 %v2166_v22, %v730_v9  ;;  %v2169_v25 = vadd.f32 %v2168_v24, %v2167_v23  ;;  %v908_v22 = vld [vmem:[%s3031_s3] sm:$0x1] }
 0x1a9   :  { %v2868_v26 = vadd.f32 %v2169_v25, %v733_v11  ;;  %v802_v34 = vmul.f32 %v2866_v59, %v2866_v59  ;;  %v929_v25 = vld [vmem:[%s3032_s4] sm:$0x1] }
 0x1ab   :  { %v2170_v58 = vpop.f32.mrb[12].mxu0  ;;  %v803_v28 = vmul.f32 %v2868_v26, %v2868_v26  ;;  %v793_v36 = vadd.f32 %v2868_v26, %v2866_v59 }
 0x1ac   :  { %v2171_v27 = vpop.f32.mrb[13].mxu0 }
 0x1ad   :  { %v2172_v30 = vadd.f32 %v2171_v27, %v2170_v58  ;;  %v2173_v31 = vpop.f32.mrb[14].mxu0  ;;  %v806_v40 = vadd.f32 %v803_v28, %v802_v34  ;;  %v2487_v34 = vld [vmem:[#allocation6 + $0x48] sm:$0xff]  }
 0x1ae   :  { %v2174_v33 = vpop.f32.mrb[15].mxu0 }
 0x1af   :  { %v2876_v37 = vadd.f32 %v2172_v30, %v738_v17  ;;  %v2175_v39 = vadd.f32 %v2174_v33, %v2173_v31  ;;  %v2896_v17 = vshrl.u32 %v62_v0, 7  ;;  %v2485_v31 = vld [vmem:[#allocation6 + $0x40] sm:$0xff]  }
 0x1b0   :  { %v2486_v33 = vld [vmem:[#allocation6] sm:$0xff]   ;;  %2195 = vmatprep.subr.bf16.mxu0 %v2485_v31  ;;  %v2514_v31 = vld [vmem:[#allocation6 + $0xa8] sm:$0xff]  }
 0x1b1   :  { %v794_v42 = vadd.f32 %v793_v36, %v2876_v37  ;;  %v804_v43 = vmul.f32 %v2876_v37, %v2876_v37  ;;  %v2881_v45 = vadd.f32 %v2175_v39, %v741_v19  ;;  %v2899_v18 = vsub.s32 %v914_v16, %v2896_v17  ;;  %v2493_v36 = vld [vmem:[#allocation6 + $0xc0] sm:$0xff]   ;;  %2196 = vmatpush3.bf16.msra.mxu0 %v2486_v33  ;;  %v2488_v39 = vld [vmem:[#allocation6 + $0x8] sm:$0xff]   ;;  %v2516_v33 = vld [vmem:[#allocation6 + $0xf0] sm:$0xff]  }
 0x1b2   :  { %v2910_v58 = vsub.s32 0, %v2896_v17  ;;  %2197 = vmatprep.subr.bf16.mxu0 %v2487_v34 }
 0x1b3   :  { %v807_v46 = vadd.f32 %v806_v40, %v804_v43  ;;  %v795_v48 = vadd.f32 %v794_v42, %v2881_v45  ;;  %v805_v49 = vmul.f32 %v2881_v45, %v2881_v45  ;;  %v2494_v40 = vld [vmem:[#allocation6 + $0x80] sm:$0xff]   ;;  %v2489_v42 = vld [vmem:[#allocation6 + $0x50] sm:$0xff]   ;;  %v2497_v43 = vld [vmem:[#allocation6 + $0xc8] sm:$0xff]  }
 0x1b5   :  { %v796_v51 = vrot.slane %v795_v48, 4  ;;  %v808_v52 = vadd.f32 %v807_v46, %v805_v49  ;;  %v2498_v46 = vld [vmem:[#allocation6 + $0x88] sm:$0xff]   ;;  %2198 = vmatpush3.bf16.msra.mxu0 %v2488_v39  ;;  %v2491_v49 = vld [vmem:[#allocation6 + $0x58] sm:$0xff]  }
 0x1b6   :  { %2199 = vmatprep.subr.bf16.mxu0 %v2489_v42  ;;  %v2520_v39 = vld [vmem:[#allocation6 + $0xf8] sm:$0xff]  }
 0x1b7   :  { %v797_v53 = vadd.f32 %v796_v51, %v795_v48  ;;  %v809_v54 = vrot.slane %v808_v52, 4  ;;  %v2490_v48 = vld [vmem:[#allocation6 + $0x10] sm:$0xff]   ;;  %v2492_v51 = vld [vmem:[#allocation6 + $0x18] sm:$0xff]  }
 0x1b9   :  { %v798_v55 = vrot.slane %v797_v53, 2  ;;  %v810_v56 = vadd.f32 %v809_v54, %v808_v52  ;;  %2200 = vmatpush3.bf16.msra.mxu0 %v2490_v48  ;;  %v2495_v52 = vld [vmem:[#allocation6 + $0x60] sm:$0xff]   ;;  %v2499_v54 = vld [vmem:[#allocation6 + $0x68] sm:$0xff]  }
 0x1ba   :  { %2201 = vmatprep.subr.bf16.mxu0 %v2491_v49 }
 0x1bb   :  { %v799_v57 = vadd.f32 %v798_v55, %v797_v53  ;;  %v811_v60 = vrot.slane %v810_v56, 2  ;;  %v2496_v53 = vld [vmem:[#allocation6 + $0x20] sm:$0xff]   ;;  %v1023_v55 = vsub.s32 1, %v2896_v17  ;;  %v1963_v17 = vld [vmem:[%s3028_s0 + $0x18] sm:$0xff] }
 0x1bd   :  { %v800_v61 = vrot.slane %v799_v57, 1  ;;  %v812_v62 = vadd.f32 %v811_v60, %v810_v56  ;;  %2202 = vmatpush3.bf16.msra.mxu0 %v2492_v51  ;;  %v2500_v56 = vld [vmem:[#allocation6 + $0x28] sm:$0xff]   ;;  %v2502_v60 = vld [vmem:[#allocation6 + $0x90] sm:$0xff]  }
 0x1be   :  { %2203 = vmatprep.subr.bf16.mxu0 %v2495_v52 }
 0x1bf   :  { %v813_v63 = vrot.slane %v812_v62, 1  ;;  %v801_v2 = vadd.f32 %v800_v61, %v799_v57  ;;  %v2501_v57 = vld [vmem:[#allocation6 + $0xd0] sm:$0xff]  }
 0x1c0   :  { %v2503_v61 = vld [vmem:[#allocation6 + $0x70] sm:$0xff]  }
 0x1c1   :  { %v814_v4 = vadd.f32 %v813_v63, %v812_v62  ;;  %2204 = vmatpush3.bf16.msra.mxu0 %v2496_v53 }
 0x1c2   :  { %2205 = vmatprep.subr.bf16.mxu0 %v2499_v54 }
 0x1c3   :  { %v815_v5 = vsel %vm103_vm7, %v801_v2, %v814_v4 }
 0x1c4   :  { %2331 = vmatmul.mubr.f32.vlgmr.msra.gmra.mrb[8].mxu1 %v815_v5  ;;  %v2504_v5 = vld [vmem:[#allocation6 + $0x30] sm:$0xff]  }
 0x1c5   :  { %2335 = vmatprep.mubr.msk.f32.mxu1 %vm2616_vm10, %v2613_v1  ;;  %2334 = vmatpush3.msra.mxu1 %v2892_v6 }
 0x1c6   :  { %2223 = vmatprep.subr.bf16.mxu1 %v2493_v36  ;;  %2206 = vmatpush3.bf16.msra.mxu0 %v2500_v56  ;;  %v2518_v36 = vld [vmem:[#allocation6 + $0xb0] sm:$0xff]  }
 0x1c7   :  { %2207 = vmatprep.subr.bf16.mxu0 %v2503_v61 }
 0x1ca   :  { %2208 = vmatpush3.bf16.msra.mxu0 %v2504_v5 }
 0x297   :  { %v898_v7 = vpop.f32.mrb[8].mxu1 }
 0x298   :  { %v902_v8 = vmul.f32 0.001953125, %v898_v7  ;;  %v2332_v9 = vpop.f32.mrb[9].mxu1  ;;  %v2505_v7 = vld [vmem:[#allocation6 + $0xd8] sm:$0xff]  }
 0x29a   :  { %v903_v10 = vmul.f32 %v902_v8, %v902_v8 }
 0x29c   :  { %v905_v11 = vrot.slane %v903_v10, 7 }
 0x29e   :  { %v907_v12 = vsub.f32 %v902_v8, %v905_v11 }
 0x2a0   :  { %v909_v13 = vadd.f32 1e-05, %v907_v12  ;;  %v2506_v12 = vld [vmem:[#allocation6 + $0x98] sm:$0xff]  }
 0x2a2   :  { %2533 = vrsqrt.f32 %v909_v13  ;;  %v2507_v13 = vld [vmem:[#allocation6 + $0x78] sm:$0xff]  }
 0x2a3   :  { %2209 = vmatprep.subr.bf16.mxu0 %v2507_v13 }
 0x2ac   :  { %v2534_v19 = vpop.eup %2533 }
 0x2ad   :  { %v918_v20 = vrot.slane %v2534_v19, %v2899_v18 }
 0x2af   :  { %v919_v21 = vcombine.high %v918_v20, %v918_v20  ;;  %v2508_v20 = vld [vmem:[#allocation6 + $0x38] sm:$0xff]  }
 0x2b0   :  { %2210 = vmatpush3.bf16.msra.mxu0 %v2508_v20 }
 0x2b1   :  { %v926_v23 = vrot.slane %v919_v21, %v2899_v18  ;;  %v2509_v21 = vld [vmem:[#allocation6 + $0xe0] sm:$0xff]  }
 0x2b3   :  { %v928_v24 = vmul.f32 %v926_v23, %v908_v22 }
 0x2b5   :  { %v930_v0 = vmul.f32 %v928_v24, %v902_v8 }
 0x2b7   :  { %v931_v27 = vsub.f32 %v929_v25, %v930_v0  ;;  %v2511_v25 = vld [vmem:[#allocation6 + $0x140] sm:$0xff]   ;;  %v2512_v0 = vld [vmem:[#allocation6 + $0xe8] sm:$0xff]  }
 0x2b8   :  { %2251 = vmatprep.subr.bf16.mxu0 %v2511_v25 }
 0x2b9   :  { %v936_v28 = vrot.slane %v931_v27, %v2910_v58 }
 0x2bb   :  { %v938_v30 = vsel %vm103_vm7, %v928_v24, %v936_v28  ;;  %v2510_v24 = vld [vmem:[#allocation6 + $0xa0] sm:$0xff]  }
 0x2bc   :  { %2336 = vmatmul.mubr.msk.f32.vlgmr.msra.gmra.mrb[10].mxu1 %vm79_vm2, %v938_v30 }
 0x2bd   :  { %2224 = vmatpush3.bf16.msra.mxu1 %v2494_v40  ;;  %v2522_v40 = vld [vmem:[#allocation6 + $0xb8] sm:$0xff]  }
 0x2be   :  { %2225 = vmatprep.subr.bf16.mxu1 %v2497_v43 }
 0x2c1   :  { %2226 = vmatpush3.bf16.msra.mxu1 %v2498_v46 }
 0x2c2   :  { %2227 = vmatprep.subr.bf16.mxu1 %v2501_v57 }
 0x2c5   :  { %2228 = vmatpush3.bf16.msra.mxu1 %v2502_v60 }
 0x2c6   :  { %2229 = vmatprep.subr.bf16.mxu1 %v2505_v7  ;;  %v2515_v7 = vld [vmem:[#allocation6 + $0x148] sm:$0xff]  }
 0x2c9   :  { %2230 = vmatpush3.bf16.msra.mxu1 %v2506_v12  ;;  %v2517_v12 = vld [vmem:[#allocation6 + $0x108] sm:$0xff]  }
 0x2ca   :  { %2231 = vmatprep.subr.bf16.mxu1 %v2509_v21 }
 0x2cd   :  { %2232 = vmatpush3.bf16.msra.mxu1 %v2510_v24 }
 0x2ce   :  { %2233 = vmatprep.subr.bf16.mxu1 %v2512_v0 }
 0x2d1   :  { %2234 = vmatpush3.bf16.msra.mxu1 %v2514_v31 }
 0x2d2   :  { %2235 = vmatprep.subr.bf16.mxu1 %v2516_v33 }
 0x2d5   :  { %2236 = vmatpush3.bf16.msra.mxu1 %v2518_v36  ;;  %v2521_v36 = vld [vmem:[#allocation6 + $0x110] sm:$0xff]  }
 0x2d6   :  { %2237 = vmatprep.subr.bf16.mxu1 %v2520_v39 }
 0x2d9   :  { %2238 = vmatpush3.bf16.msra.mxu1 %v2522_v40 }
 0x2da   :  { %2402 = vmatprep.subr.bf16.mxu1 %v2615_v29 }
 0x38f   :  { %v1009_v62 = vpop.f32.mrb[10].mxu1 }
 0x390   :  { %v1016_v63 = vrot.slane %v1009_v62, %v2910_v58  ;;  %v2337_v2 = vpop.f32.mrb[11].mxu1  ;;  %v1024_v4 = vrot.slane %v1009_v62, %v1023_v55 }
 0x391   :  { %v2513_v2 = vld [vmem:[#allocation6 + $0x100] sm:$0xff]  }
 0x392   :  { %v1017_v8 = vmul.f32 %v1016_v63, %v2866_v59  ;;  %v1018_v9 = vmul.f32 %v1016_v63, %v2868_v26  ;;  %v1019_v10 = vmul.f32 %v1016_v63, %v2876_v37  ;;  %v1020_v11 = vmul.f32 %v1016_v63, %v2881_v45 }
 0x394   :  { %v1025_v14 = vadd.f32 %v1024_v4, %v1017_v8  ;;  %v1026_v15 = vadd.f32 %v1024_v4, %v1018_v9  ;;  %v1027_v16 = vadd.f32 %v1024_v4, %v1019_v10  ;;  %v1028_v19 = vadd.f32 %v1024_v4, %v1020_v11 }
 0x396   :  { %v1029_v22 = vmax.f32 %v1025_v14, 0.0  ;;  %v1030_v59 = vmax.f32 %v1026_v15, 0.0  ;;  %v1031_v23 = vmax.f32 %v1027_v16, 0.0  ;;  %v1032_v26 = vmax.f32 %v1028_v19, 0.0  ;;  %v2519_v16 = vld [vmem:[#allocation6 + $0x150] sm:$0xff]  }
 0x398   :  { %v1037_v37 = vrot.slane %v1029_v22, 7  ;;  %v1038_v45 = vrot.slane %v1030_v59, 7  ;;  %v1040_v28 = vrot.slane %v1031_v23, 7  ;;  %v1041_v30 = vrot.slane %v1032_v26, 7 }
 0x39a   :  { %1043 = vrot.lane.b32.xlu0 %v1037_v37, %s2614_s20  ;;  %v1039_v27 = vsel %vm103_vm7, %v1037_v37, %v1038_v45  ;;  %v1042_v34 = vsel %vm103_vm7, %v1040_v28, %v1041_v30 }
 0x39b   :  { %1045 = vrot.lane.b32.xlu1 %v1039_v27, %s2614_s20 }
 0x39e   :  { %1049 = vrot.lane.b32.xlu0 %v1040_v28, %s2614_s20 }
 0x39f   :  { %1051 = vrot.lane.b32.xlu1 %v1042_v34, %s2614_s20 }
 0x3a2   :  { %1047 = vrot.lane.b32.xlu0 %v1038_v45, %s2614_s20 }
 0x3a3   :  { %1053 = vrot.lane.b32.xlu1 %v1041_v30, %s2614_s20 }
 0x40c   :  { %v1044_v42 = vpop.permute.xlu0 %1043 }
 0x40d   :  { %1061 = vst.msk [vmem:[#allocation2] sm:$0xfe] %vm86_vm1, %v1044_v42  ;;  %v1046_v43 = vpop.permute.xlu1 %1045 }
 0x40e   :  { %1062 = vst.msk [vmem:[#allocation2 + $0x8] sm:$0xfe] %vm77_vm0, %v1044_v42 }
 0x40f   :  { %1063 = vst.msk [vmem:[#allocation2 + $0x10] sm:$0xff] %vm88_vm3, %v1046_v43 }
 0x410   :  { %1064 = vst.msk [vmem:[#allocation2 + $0x18] sm:$0xff] %vm79_vm2, %v1046_v43  ;;  %v1050_v46 = vpop.permute.xlu0 %1049 }
 0x411   :  { %1067 = vst.msk [vmem:[#allocation2 + $0x30] sm:$0xfe] %vm86_vm1, %v1050_v46  ;;  %v1052_v48 = vpop.permute.xlu1 %1051 }
 0x412   :  { %1068 = vst.msk [vmem:[#allocation2 + $0x38] sm:$0xfe] %vm77_vm0, %v1050_v46 }
 0x413   :  { %1069 = vst.msk [vmem:[#allocation2 + $0x40] sm:$0xff] %vm88_vm3, %v1052_v48 }
 0x414   :  { %1070 = vst.msk [vmem:[#allocation2 + $0x48] sm:$0xff] %vm79_vm2, %v1052_v48  ;;  %v1048_v49 = vpop.permute.xlu0 %1047  ;;  %v1073_v53 = vld [vmem:[#allocation2] sm:$0xff] }
 0x415   :  { %v1074_v51 = vld [vmem:[#allocation2 + $0x8] sm:$0xff]  ;;  %1065 = vst.msk [vmem:[#allocation2 + $0x20] sm:$0x1] %vm90_vm5, %v1048_v49  ;;  %v1054_v54 = vpop.permute.xlu1 %1053  ;;  %v1085_v5 = vld [vmem:[#allocation2] sm:$0xfe] }
 0x416   :  { %v1086_v52 = vld [vmem:[#allocation2 + $0x8] sm:$0xfe]  ;;  %1066 = vst.msk [vmem:[#allocation2 + $0x28] sm:$0x1] %vm81_vm4, %v1048_v49  ;;  %v2942_v57 = vld [vmem:[#allocation2 + $0x10] sm:$0xff]  ;;  %v2523_v49 = vld [vmem:[#allocation6 + $0x158] sm:$0xff]  }
 0x417   :  { %v1076_v56 = vld [vmem:[#allocation2 + $0x18] sm:$0xff]  ;;  %v1102_v60 = vld [vmem:[#allocation2 + $0x8] sm:$0xfc]  ;;  %1071 = vst.msk [vmem:[#allocation2 + $0x50] sm:$0x1] %vm90_vm5, %v1054_v54  ;;  %v1081_v63 = vpack.c.bf16 %v2942_v57, %v1073_v53  ;;  %v1093_v8 = vpack.c.bf16 %v2942_v57, %v1085_v5 }
 0x418   :  { %1072 = vst.msk [vmem:[#allocation2 + $0x58] sm:$0x1] %vm81_vm4, %v1054_v54  ;;  %v1082_v61 = vpack.c.bf16 %v1076_v56, %v1074_v51  ;;  %v1094_v62 = vpack.c.bf16 %v1076_v56, %v1086_v52  ;;  %v1110_v4 = vpack.c.bf16 %v1076_v56, %v1102_v60  ;;  %v1077_v19 = vld [vmem:[#allocation2 + $0x30] sm:$0xff] }
 0x419   :  { %v1078_v9 = vld [vmem:[#allocation2 + $0x38] sm:$0xff]  ;;  %v1089_v22 = vld [vmem:[#allocation2 + $0x30] sm:$0xfe]  ;;  %v1118_v26 = vshrl.u32 %v1093_v8, 16  ;;  %v1120_v24 = vshll.u32 %v1093_v8, 16 }
 0x41a   :  { %1609 = vmatprep.mubr.bf16.mxu0 %v1082_v61  ;;  %v1090_v10 = vld [vmem:[#allocation2 + $0x38] sm:$0xfe]  ;;  %v1132_v13 = vshll.u32 %v1094_v62, 16  ;;  %v2952_v20 = vld [vmem:[#allocation2 + $0x40] sm:$0xff]  ;;  %v1180_v21 = vrot.slane %v1110_v4, 1  ;;  %v1130_v59 = vshrl.u32 %v1094_v62, 16 }
 0x41b   :  { %1610 = vmatmul.mubr.bf16.vlgmr.msra.gmra.mrb[16].mxu0 %v1081_v63  ;;  %v2948_v11 = vld [vmem:[#allocation2 + $0x48] sm:$0xff]  ;;  %v1083_v0 = vpack.c.bf16 %v2952_v20, %v1077_v19  ;;  %v1097_v34 = vpack.c.bf16 %v2952_v20, %v1089_v22  ;;  %v1122_v39 = vrot.slane %v1120_v24, 1 }
 0x41c   :  { %2252 = vmatpush3.bf16.msra.mxu0 %v2513_v2  ;;  %v1084_v14 = vpack.c.bf16 %v2948_v11, %v1078_v9  ;;  %v1098_v15 = vpack.c.bf16 %v2948_v11, %v1090_v10  ;;  %v1134_v23 = vrot.slane %v1132_v13, 1  ;;  %v1087_v25 = vld [vmem:[#allocation2 + $0x20] sm:$0x1]  ;;  %v2524_v2 = vld [vmem:[#allocation6 + $0x118] sm:$0xff]  }
 0x41d   :  { %2253 = vmatprep.subr.bf16.mxu0 %v2515_v7  ;;  %v1104_v37 = vld [vmem:[#allocation2 + $0x28] sm:$0x3]  ;;  %v1095_v30 = vpack.c.bf16 %v1087_v25, %v1087_v25  ;;  %v1123_v62 = vor.u32 %v1122_v39, %v1118_v26  ;;  %v1144_v7 = vshll.u32 %v1097_v34, 16  ;;  %v2525_v10 = vld [vmem:[#allocation6 + $0x160] sm:$0xff]   ;;  %v1142_v19 = vshrl.u32 %v1097_v34, 16 }
 0x41e   :  { %1617 = vmatprep.mubr.bf16.mxu0 %v1084_v14  ;;  %v1088_v45 = vld [vmem:[#allocation2 + $0x28] sm:$0x1]  ;;  %v1112_v27 = vpack.c.bf16 %v1104_v37, %v1104_v37  ;;  %v1091_v33 = vld [vmem:[#allocation2 + $0x50] sm:$0x1]  ;;  %v1156_v42 = vshll.u32 %v1098_v15, 16  ;;  %v1135_v46 = vor.u32 %v1134_v23, %v1130_v59  ;;  %v1154_v52 = vshrl.u32 %v1098_v15, 16 }
 0x41f   :  { %v1096_v28 = vpack.c.bf16 %v1088_v45, %v1088_v45  ;;  %v1092_v31 = vld [vmem:[#allocation2 + $0x58] sm:$0x1]  ;;  %v1125_v51 = vshll.u32 %v1095_v30, 16  ;;  %v1099_v56 = vpack.c.bf16 %v1091_v33, %v1091_v33  ;;  %v2526_v14 = vld [vmem:[#allocation6 + $0x120] sm:$0xff]   ;;  %v1146_v15 = vrot.slane %v1144_v7, 1  ;;  %v2528_v59 = vld [vmem:[#allocation6 + $0x128] sm:$0xff]  }
 0x420   :  { %2254 = vmatpush3.bf16.msra.mxu0 %v2517_v12  ;;  %v1100_v40 = vpack.c.bf16 %v1092_v31, %v1092_v31  ;;  %v1181_v43 = vrot.slane %v1112_v27, 1  ;;  %v1158_v53 = vrot.slane %v1156_v42, 1  ;;  %v2529_v23 = vld [vmem:[#allocation6 + $0x170] sm:$0xff]   ;;  %v1103_v24 = vld [vmem:[#allocation2 + $0x20] sm:$0x3]  ;;  %v2531_v45 = vld [vmem:[#allocation6 + $0x178] sm:$0xff]  }
 0x421   :  { %2255 = vmatprep.subr.bf16.mxu0 %v2519_v16  ;;  %v1137_v48 = vshll.u32 %v1096_v28, 16  ;;  %v1127_v63 = vrot.slane %v1125_v51, 1  ;;  %v1149_v13 = vshll.u32 %v1099_v56, 16  ;;  %v2527_v16 = vld [vmem:[#allocation6 + $0x168] sm:$0xff]   ;;  %v1147_v22 = vor.u32 %v1146_v15, %v1142_v19  ;;  %v2530_v37 = vld [vmem:[#allocation6 + $0x130] sm:$0xff]   ;;  %v2532_v28 = vld [vmem:[#allocation6 + $0x138] sm:$0xff]  }
 0x422   :  { %v1161_v54 = vshll.u32 %v1100_v40, 16  ;;  %v1182_v60 = vsel %vm245_vm9, %v1180_v21, %v1181_v43  ;;  %v1159_v4 = vor.u32 %v1158_v53, %v1154_v52  ;;  %v1101_v25 = vld [vmem:[#allocation2] sm:$0xfc]  ;;  %v1106_v27 = vld [vmem:[#allocation2 + $0x38] sm:$0xfc] }
 0x423   :  { %1618 = vmatmul.mubr.bf16.gmra.mrb[20].mxu0 %v1083_v0  ;;  %v1139_v61 = vrot.slane %v1137_v48, 1  ;;  %v1128_v9 = vsel %vm184_vm8, %v1123_v62, %v1127_v63  ;;  %v1151_v21 = vrot.slane %v1149_v13, 1  ;;  %v1111_v0 = vpack.c.bf16 %v1103_v24, %v1103_v24  ;;  %v1105_v40 = vld [vmem:[#allocation2 + $0x30] sm:$0xfc] }
 0x424   :  { %2256 = vmatpush3.bf16.msra.mxu0 %v2521_v36  ;;  %1707 = vmatprep.mubr.bf16.mxu0 %v1182_v60  ;;  %v1163_v5 = vrot.slane %v1161_v54, 1  ;;  %v1109_v30 = vpack.c.bf16 %v2942_v57, %v1101_v25  ;;  %v1114_v31 = vpack.c.bf16 %v2948_v11, %v1106_v27  ;;  %v1107_v36 = vld [vmem:[#allocation2 + $0x50] sm:$0x3] }
 0x425   :  { %v1140_v8 = vsel %vm184_vm8, %v1135_v46, %v1139_v61  ;;  %2257 = vmatprep.subr.bf16.mxu0 %v2523_v49  ;;  %v1152_v26 = vsel %vm184_vm8, %v1147_v22, %v1151_v21  ;;  %v1178_v33 = vrot.slane %v1111_v0, 1  ;;  %v1115_v43 = vpack.c.bf16 %v1107_v36, %v1107_v36 }
 0x426   :  { %1658 = vmatprep.mubr.bf16.mxu1 %v1140_v8  ;;  %v1164_v12 = vsel %vm184_vm8, %v1159_v4, %v1163_v5  ;;  %v1186_v39 = vrot.slane %v1114_v31, 1 }
 0x427   :  { %1659 = vmatmul.mubr.bf16.vlgmr.msra.gmra.mrb[12].mxu1 %v1128_v9  ;;  %v1184_v11 = vrot.slane %v1115_v43, 1 }
 0x428   :  { %2258 = vmatpush3.bf16.msra.mxu0 %v2524_v2  ;;  %1666 = vmatprep.mubr.bf16.mxu1 %v1164_v12 }
 0x429   :  { %2259 = vmatprep.subr.bf16.mxu0 %v2525_v10  ;;  %2404 = vmatpush3.bf16.msra.mxu1 %v2790_v3  ;;  %v1108_v3 = vld [vmem:[#allocation2 + $0x58] sm:$0x3] }
 0x42a   :  { %2405 = vmatprep.subr.bf16.mxu1 %v2615_v29 }
 0x42c   :  { %2260 = vmatpush3.bf16.msra.mxu0 %v2526_v14 }
 0x42d   :  { %2261 = vmatprep.subr.bf16.mxu0 %v2527_v16  ;;  %2407 = vmatpush3.bf16.msra.mxu1 %v2800_v32  ;;  %v1116_v32 = vpack.c.bf16 %v1108_v3, %v1108_v3 }
 0x42e   :  { %2408 = vmatprep.subr.bf16.mxu1 %v2615_v29 }
 0x42f   :  { %1667 = vmatmul.mubr.bf16.gmra.mrb[16].mxu1 %v1152_v26  ;;  %v1187_v34 = vrot.slane %v1116_v32, 1 }
 0x430   :  { %2262 = vmatpush3.bf16.msra.mxu0 %v2528_v59  ;;  %2370 = vmatprep.mubr.msk.f32.mxu1 %vm2616_vm10, %v2613_v1 }
 0x431   :  { %2263 = vmatprep.subr.bf16.mxu0 %v2529_v23  ;;  %2410 = vmatpush3.bf16.msra.mxu1 %v2810_v35  ;;  %v1177_v35 = vrot.slane %v1109_v30, 1  ;;  %v1188_v57 = vsel %vm245_vm9, %v1186_v39, %v1187_v34 }
 0x432   :  { %2411 = vmatprep.subr.bf16.mxu1 %v2615_v29 }
 0x433   :  { %v1179_v42 = vsel %vm245_vm9, %v1177_v35, %v1178_v33 }
 0x434   :  { %2264 = vmatpush3.bf16.msra.mxu0 %v2530_v37 }
 0x435   :  { %2265 = vmatprep.subr.bf16.mxu0 %v2531_v45  ;;  %2413 = vmatpush3.bf16.msra.mxu1 %v2820_v38  ;;  %v1113_v38 = vpack.c.bf16 %v2952_v20, %v1105_v40 }
 0x436   :  { %2414 = vmatprep.subr.bf16.mxu1 %v2615_v29 }
 0x437   :  { %v1183_v46 = vrot.slane %v1113_v38, 1 }
 0x438   :  { %2266 = vmatpush3.bf16.msra.mxu0 %v2532_v28 }
 0x439   :  { %2416 = vmatpush3.bf16.msra.mxu1 %v2830_v41  ;;  %v1185_v41 = vsel %vm245_vm9, %v1183_v46, %v1184_v11 }
 0x43a   :  { %2417 = vmatprep.subr.bf16.mxu1 %v2615_v29 }
 0x43b   :  { %1708 = vmatmul.mubr.bf16.vlgmr.msra.gmra.mrb[24].mxu0 %v1179_v42 }
 0x43c   :  { %1715 = vmatprep.mubr.bf16.mxu0 %v1188_v57 }
 0x43d   :  { %2419 = vmatpush3.bf16.msra.mxu1 %v2841_v44 }
 0x43e   :  { %2420 = vmatprep.subr.bf16.mxu1 %v2615_v29 }
 0x441   :  { %2422 = vmatpush3.bf16.msra.mxu1 %v2851_v47 }
 0x442   :  { %2423 = vmatprep.subr.bf16.mxu1 %v2615_v29 }
 0x443   :  { %1716 = vmatmul.mubr.bf16.gmra.mrb[28].mxu0 %v1185_v41 }
 0x445   :  { %2425 = vmatpush3.bf16.msra.mxu1 %v2861_v50 }
 0x446   :  { %2373 = vmatprep.subr.mxu1 %v2613_v1 }
 0x4ee   :  { %v2211_v48 = vpop.f32.mrb[16].mxu0 }
 0x4ef   :  { %v2212_v49 = vpop.f32.mrb[17].mxu0 }
 0x4f0   :  { %v2213_v20 = vadd.f32 %v2212_v49, %v2211_v48  ;;  %v2214_v51 = vpop.f32.mrb[18].mxu0 }
 0x4f1   :  { %v2215_v44 = vpop.f32.mrb[19].mxu0 }
 0x4f2   :  { %v2216_v52 = vadd.f32 %v2215_v44, %v2214_v51 }
 0x4f6   :  { %v2217_v53 = vpop.f32.mrb[20].mxu0 }
 0x4f7   :  { %v2218_v54 = vpop.f32.mrb[21].mxu0 }
 0x4f8   :  { %v2219_v56 = vadd.f32 %v2218_v54, %v2217_v53  ;;  %v2220_v60 = vpop.f32.mrb[22].mxu0 }
 0x4f9   :  { %v2221_v47 = vpop.f32.mrb[23].mxu0 }
 0x4fa   :  { %v2222_v61 = vadd.f32 %v2221_v47, %v2220_v60  ;;  %v2239_v62 = vpop.f32.mrb[12].mxu1 }
 0x4fb   :  { %v2240_v63 = vpop.f32.mrb[13].mxu1 }
 0x4fc   :  { %v2241_v29 = vadd.f32 %v2240_v63, %v2239_v62  ;;  %v2242_v2 = vpop.f32.mrb[14].mxu1 }
 0x4fd   :  { %v2243_v4 = vpop.f32.mrb[15].mxu1 }
 0x4fe   :  { %v1661_v50 = vadd.f32 %v2241_v29, %v2213_v20  ;;  %v2244_v5 = vadd.f32 %v2243_v4, %v2242_v2 }
 0x500   :  { %v1664_v7 = vadd.f32 %v2244_v5, %v2216_v52 }
 0x502   :  { %v2245_v8 = vpop.f32.mrb[16].mxu1 }
 0x503   :  { %v2246_v9 = vpop.f32.mrb[17].mxu1 }
 0x504   :  { %v2247_v10 = vadd.f32 %v2246_v9, %v2245_v8  ;;  %v2248_v12 = vpop.f32.mrb[18].mxu1 }
 0x505   :  { %v2249_v13 = vpop.f32.mrb[19].mxu1 }
 0x506   :  { %v1669_v14 = vadd.f32 %v2247_v10, %v2219_v56  ;;  %v2250_v15 = vadd.f32 %v2249_v13, %v2248_v12 }
 0x508   :  { %v1672_v16 = vadd.f32 %v2250_v15, %v2222_v61 }
 0x50e   :  { %v2267_v19 = vpop.f32.mrb[24].mxu0 }
 0x50f   :  { %v2268_v21 = vpop.f32.mrb[25].mxu0 }
 0x510   :  { %v2269_v22 = vadd.f32 %v2268_v21, %v2267_v19  ;;  %v2270_v59 = vpop.f32.mrb[26].mxu0 }
 0x511   :  { %v2271_v23 = vpop.f32.mrb[27].mxu0 }
 0x512   :  { %v1710_v26 = vadd.f32 %v2269_v22, %v1661_v50  ;;  %v2272_v24 = vadd.f32 %v2271_v23, %v2270_v59  ;;  %v1960_v23 = vld [vmem:[%s3028_s0] sm:$0xff] }
 0x514   :  { %v1713_v37 = vadd.f32 %v2272_v24, %v1664_v7  ;;  %v1733_v28 = vmul.f32 %v1710_v26, %v1710_v26  ;;  %v1839_v7 = vld [vmem:[%s3033_s5] sm:$0x1]  ;;  %v1961_v24 = vld [vmem:[%s3028_s0 + $0x8] sm:$0xff] }
 0x516   :  { %v2273_v3 = vpop.f32.mrb[28].mxu0  ;;  %v1734_v25 = vmul.f32 %v1713_v37, %v1713_v37  ;;  %v1724_v30 = vadd.f32 %v1713_v37, %v1710_v26 }
 0x517   :  { %v2274_v45 = vpop.f32.mrb[29].mxu0 }
 0x518   :  { %v2275_v0 = vadd.f32 %v2274_v45, %v2273_v3  ;;  %v2276_v27 = vpop.f32.mrb[30].mxu0  ;;  %v1737_v34 = vadd.f32 %v1734_v25, %v1733_v28 }
 0x519   :  { %v2277_v32 = vpop.f32.mrb[31].mxu0 }
 0x51a   :  { %v1718_v31 = vadd.f32 %v2275_v0, %v1669_v14  ;;  %v2278_v33 = vadd.f32 %v2277_v32, %v2276_v27 }
 0x51c   :  { %v1725_v36 = vadd.f32 %v1724_v30, %v1718_v31  ;;  %v1735_v35 = vmul.f32 %v1718_v31, %v1718_v31  ;;  %v1721_v39 = vadd.f32 %v2278_v33, %v1672_v16 }
 0x51e   :  { %v1738_v40 = vadd.f32 %v1737_v34, %v1735_v35  ;;  %v1726_v42 = vadd.f32 %v1725_v36, %v1721_v39  ;;  %v1736_v43 = vmul.f32 %v1721_v39, %v1721_v39 }
 0x520   :  { %v1727_v57 = vrot.slane %v1726_v42, 4  ;;  %v1739_v38 = vadd.f32 %v1738_v40, %v1736_v43 }
 0x522   :  { %v1728_v11 = vadd.f32 %v1727_v57, %v1726_v42  ;;  %v1740_v46 = vrot.slane %v1739_v38, 4 }
 0x524   :  { %v1729_v41 = vrot.slane %v1728_v11, 2  ;;  %v1741_v48 = vadd.f32 %v1740_v46, %v1739_v38 }
 0x526   :  { %v1730_v49 = vadd.f32 %v1729_v41, %v1728_v11  ;;  %v1742_v20 = vrot.slane %v1741_v48, 2 }
 0x528   :  { %v1731_v51 = vrot.slane %v1730_v49, 1  ;;  %v1743_v44 = vadd.f32 %v1742_v20, %v1741_v48 }
 0x52a   :  { %v1744_v52 = vrot.slane %v1743_v44, 1  ;;  %v1732_v53 = vadd.f32 %v1731_v51, %v1730_v49 }
 0x52c   :  { %v1745_v54 = vadd.f32 %v1744_v52, %v1743_v44 }
 0x52e   :  { %v1746_v56 = vsel %vm103_vm7, %v1732_v53, %v1745_v54 }
 0x52f   :  { %2371 = vmatmul.mubr.f32.vlgmr.msra.gmra.mrb[20].mxu1 %v1746_v56 }
 0x530   :  { %2374 = vmatpush3.msra.mxu1 %v2892_v6  ;;  %2375 = vmatprep.mubr.msk.f32.mxu1 %vm2616_vm10, %v2613_v1  ;;  %v1860_v1 = vld [vmem:[%s3034_s6] sm:$0x1] }
 0x602   :  { %v1829_v60 = vpop.f32.mrb[20].mxu1 }
 0x603   :  { %v1833_v47 = vmul.f32 0.001953125, %v1829_v60  ;;  %v2372_v61 = vpop.f32.mrb[21].mxu1 }
 0x605   :  { %v1834_v62 = vmul.f32 %v1833_v47, %v1833_v47 }
 0x607   :  { %v1836_v63 = vrot.slane %v1834_v62, 7 }
 0x609   :  { %v1838_v29 = vsub.f32 %v1833_v47, %v1836_v63 }
 0x60b   :  { %v1840_v2 = vadd.f32 1e-05, %v1838_v29 }
 0x60d   :  { %2535 = vrsqrt.f32 %v1840_v2 }
 0x617   :  { %v2536_v4 = vpop.eup %2535 }
 0x618   :  { %v1849_v50 = vrot.slane %v2536_v4, %v2899_v18 }
 0x61a   :  { %v1850_v5 = vcombine.high %v1849_v50, %v1849_v50 }
 0x61c   :  { %v1857_v6 = vrot.slane %v1850_v5, %v2899_v18 }
 0x61e   :  { %v1859_v8 = vmul.f32 %v1857_v6, %v1839_v7 }
 0x620   :  { %v1861_v9 = vmul.f32 %v1859_v8, %v1833_v47 }
 0x622   :  { %v1862_v10 = vsub.f32 %v1860_v1, %v1861_v9 }
 0x624   :  { %v1867_v12 = vrot.slane %v1862_v10, %v2910_v58 }
 0x626   :  { %v1869_v13 = vsel %vm103_vm7, %v1859_v8, %v1867_v12 }
 0x627   :  { %2376 = vmatmul.mubr.msk.f32.vlgmr.msra.gmra.mrb[22].mxu1 %vm79_vm2, %v1869_v13 }
 0x6fa   :  { %v1940_v14 = vpop.f32.mrb[22].mxu1 }
 0x6fb   :  { %v1947_v15 = vrot.slane %v1940_v14, %v2910_v58  ;;  %v2377_v16 = vpop.f32.mrb[23].mxu1  ;;  %v1955_v18 = vrot.slane %v1940_v14, %v1023_v55  ;;  %v1962_v58 = vld [vmem:[%s3028_s0 + $0x10] sm:$0xff]  ;;  %s2581_s0 = scalar_lea.vmem %s1982_s22, 512 }
 0x6fc   :  { %p2582_p2 = scmp.ne.s32.totalorder %s1982_s22, %s2581_s0  ;;  %p2587_p4 = scmp.lt.s32.totalorder %s2581_s0, %s2581_s0 }
 0x6fd   :  { %v1948_v19 = vmul.f32 %v1947_v15, %v1710_v26  ;;  %v1949_v21 = vmul.f32 %v1947_v15, %v1713_v37  ;;  %v1950_v22 = vmul.f32 %v1947_v15, %v1718_v31  ;;  %v1951_v59 = vmul.f32 %v1947_v15, %v1721_v39 }
 0x6fe   :  { %p2588_p5 = por %p2587_p4, %p2586_p3 }
 0x6ff   :  { %v1956_v55 = vadd.f32 %v1955_v18, %v1948_v19  ;;  %v1957_v26 = vadd.f32 %v1955_v18, %v1949_v21  ;;  %v1958_v37 = vadd.f32 %v1955_v18, %v1950_v22  ;;  %v1959_v3 = vadd.f32 %v1955_v18, %v1951_v59 }
 0x700   :  { %p2589_p6 = pnand %p2588_p5, %p2582_p2 }
 0x701   :  { %v1964_v45 = vadd.f32 %v1960_v23, %v1956_v55  ;;  %v1965_v25 = vadd.f32 %v1961_v24, %v1957_v26  ;;  %v1966_v0 = vadd.f32 %v1962_v58, %v1958_v37  ;;  %v1967_v27 = vadd.f32 %v1963_v17, %v1959_v3 }
 0x703   :  { %v1968_v32 = vmax.f32 %v1964_v45, 0.0  ;;  %v1969_v28 = vmax.f32 %v1965_v25, 0.0  ;;  %v1970_v30 = vmax.f32 %v1966_v0, 0.0  ;;  %v1971_v31 = vmax.f32 %v1967_v27, 0.0 }
 0x705   :  { %1972 = vst [vmem:[#allocation8] sm:$0xff] %v1968_v32  ;;  %1973 = vst [vmem:[#allocation8 + $0x8] sm:$0xff] %v1969_v28 }
 0x706   :  { %1974 = vst [vmem:[#allocation8 + $0x10] sm:$0xff] %v1970_v30  ;;  %1975 = vst [vmem:[#allocation8 + $0x18] sm:$0xff] %v1971_v31 }
 0x707   :  { %2592 = shalt.err (!%p2589_p6)
}
 0x708   :  { %s2593_s25 = scalar_lea.hbm %s3037_s9, 512 }
 0x709   :  { %p2594_p7 = scmp.ne.s32.totalorder %s3037_s9, %s2593_s25  ;;  %p2597_p8 = scmp.lt.u32.totalorder %s2593_s25, %s3037_s9 }
 0x70b   :  { %p2599_p9 = pnand %p2597_p8, %p2594_p7 }
 0x70d   :  { %2602 = shalt.err (!%p2599_p9)
}
 0x70e   :  { %s2619_s30 = smov 128  }
 0x70f   :  { %1987 = dma.vmem_to_hbm [thread:$0]  %s1982_s22, 512, %s3037_s9, [#allocation5], %s2619_s30, %s2619_s30, %s2614_s20  }
 0x710   :  { %2607 = dma.done.wait [#allocation5], 512  }
 0x711   :  { %2608 = vsyncadd [#allocation5], 4294966784 }
 0x712   :  { %1991 = vsyncpa [#allocation4], 1 }
 0x713   :  { %1992 = vsyncpa [#allocation7], 1 }
 0x714   :  { %1993 = vsyncpa [#allocation5], 1 }

</bundles_post_ra>
